<compile_context>
chip_gen: v7x
topology: tpu7x:2x2x1
jax: 0.10.0
libtpu: 0.0.40
codegen_flags: <defaults>
</compile_context>

<pallas_src>
import functools
import math

import jax
import jax.numpy as jnp
from jax import lax
from jax.experimental import pallas as pl
from jax.experimental.pallas import tpu as pltpu


# ----------------------------------------------------------------------------
# Fused kernel: one batch element -> multi-head causal attention + projection.
#   qkv  = x @ Wqkv                      (T, 3C)   one wide MXU matmul
#   s    = batched Q @ K^T               (H, T, T) (scale pre-folded into Q)
#   e    = exp(s - rowmax)  (masked)     (H, T, T) f32 softmax math
#   out  = (e @ V) * 1/rowsum            (H, T, hs) deferred normalization
#   y    = concat_h(out) @ Wp + bp       (T, C)    lane-dense store
# ----------------------------------------------------------------------------
def _fused_mha_kernel(x_ref, wqkv_ref, wproj_ref, b_ref, o_ref, *,
                      num_heads, head_size, compute_dtype):
    mx = compute_dtype
    T, C = x_ref.shape[1], x_ref.shape[2]

    x = x_ref[0].astype(mx)                       # (T, C)   MXU input dtype
    wqkv = wqkv_ref[...].astype(mx)               # (C, 3C)  Q cols pre-scaled
    wp = wproj_ref[...].astype(mx)                # (C, C)
    b = b_ref[...].astype(jnp.float32)            # (1, C)

    # All heads' Q, K, V in ONE wide MXU matmul, f32 accumulation.
    qkv = jnp.dot(x, wqkv, preferred_element_type=jnp.float32)     # (T, 3C)

    # Split into (T, H, hs) blocks; stays in VMEM, no HBM round-trip.
    q = qkv[:, :C].reshape(T, num_heads, head_size)
    k = qkv[:, C:2 * C].reshape(T, num_heads, head_size)
    v = qkv[:, 2 * C:].reshape(T, num_heads, head_size)

    # Batched Q @ K^T over all heads at once: (H, Tq, Tk), f32 accumulation.
    s = lax.dot_general(q.astype(mx), k.astype(mx),
                        (((2,), (2,)), ((1,), (1,))),
                        preferred_element_type=jnp.float32)

    # Causal mask, built once and shared by every head. Large finite negative
    # (not -inf) keeps exp() NaN-free even for fully-masked rows.
    row = lax.broadcasted_iota(jnp.int32, (T, T), 0)
    col = lax.broadcasted_iota(jnp.int32, (T, T), 1)
    causal = col <= row
    s = jnp.where(causal[None], s, -1e30)

    # Numerically-stable softmax in f32 (v5e VPU/EUP have no bf16 anyway),
    # with DEFERRED normalization: matmul the raw exp-scores, rescale after.
    m = jnp.max(s, axis=-1, keepdims=True)        # (H, T, 1)
    e = jnp.exp(s - m)                            # (H, T, T)
    denom = jnp.sum(e, axis=-1, keepdims=True)    # (H, T, 1)

    out = lax.dot_general(e.astype(mx), v.astype(mx),
                          (((2,), (0,)), ((0,), (1,))),
                          preferred_element_type=jnp.float32)      # (H, T, hs)
    out = out * (1.0 / denom)                     # exact; O(H*T*hs) not O(T^2)

    # "Concat heads": (H, T, hs) -> (T, H*hs) = (T, C); pure VMEM relayout.
    cat = jnp.transpose(out, (1, 0, 2)).reshape(T, C)

    # Fused output-projection epilogue; lane-dense (T, C) store.
    y = jnp.dot(cat.astype(mx), wp, preferred_element_type=jnp.float32) + b
    o_ref[0] = y.astype(o_ref.dtype)


def _make_call(B, T, C, H, hs, out_dtype, compute_dtype, *,
               single_buffer_weights):
    kernel = functools.partial(_fused_mha_kernel, num_heads=H, head_size=hs,
                               compute_dtype=compute_dtype)

    # Constant operands (index_map is always (0, 0)) are fetched once; a single
    # VMEM buffer suffices.  Halving the resident weight footprint is what
    # keeps production-sized weights inside v7x's 64 MiB VMEM.
    wkw = dict(pipeline_mode=pl.Buffered(1)) if single_buffer_weights else {}

    flops = 2 * B * (T * C * 3 * C + H * T * T * hs * 2 + T * C * C)
    transcendentals = B * H * T * T
    bytes_accessed = 4 * (2 * B * T * C + 3 * C * C + C * C + C)
    cost = pl.CostEstimate(flops=flops, transcendentals=transcendentals,
                           bytes_accessed=bytes_accessed)

    return pl.pallas_call(
        kernel,
        out_shape=jax.ShapeDtypeStruct((B, T, C), out_dtype),
        grid_spec=pltpu.PrefetchScalarGridSpec(
            num_scalar_prefetch=0,
            grid=(B,),
            in_specs=[
                pl.BlockSpec((1, T, C), lambda b: (b, 0, 0)),
                pl.BlockSpec((C, 3 * C), lambda b: (0, 0), **wkw),
                pl.BlockSpec((C, C), lambda b: (0, 0), **wkw),
                pl.BlockSpec((1, C), lambda b: (0, 0), **wkw),
            ],
            out_specs=pl.BlockSpec((1, T, C), lambda b: (b, 0, 0)),
        ),
        compiler_params=pltpu.CompilerParams(
            dimension_semantics=("parallel",)),     # batch across TCs on v7x
        cost_estimate=cost,
    )


def multi_head_attention(x, wq, wk, wv, w_proj, b_proj, *,
                         compute_dtype=jnp.bfloat16):
    """x: (B, T, C); wq/wk/wv: (H, C, hs); w_proj: (C, C); b_proj: (C,)."""
    B, T, C = x.shape
    H, _, hs = wq.shape
    assert H * hs == C

    def flatten_heads(w):                           # (H, C, hs) -> (C, H*hs)
        return jnp.transpose(w, (1, 0, 2)).reshape(C, H * hs)

    # Fold every head into one wide (C, 3C) QKV weight and fold the module's
    # C**-0.5 (n_embd) score scale into the Q columns -> zero in-kernel scaling.
    w_qkv = jnp.concatenate(
        [flatten_heads(wq) * (C ** -0.5), flatten_heads(wk), flatten_heads(wv)],
        axis=1)
    b2d = b_proj.reshape(1, C)
    args = (x, w_qkv, w_proj, b2d)

    try:
        return _make_call(B, T, C, H, hs, x.dtype, compute_dtype,
                          single_buffer_weights=True)(*args)
    except Exception:
        # pl.Buffered(1) not supported by this JAX version / backend:
        # fall back to default double-buffered weight BlockSpecs.
        return _make_call(B, T, C, H, hs, x.dtype, compute_dtype,
                          single_buffer_weights=False)(*args)


# ----------------------------------------------------------------------------
# Pure-JAX reference (mirrors the PyTorch module exactly)
# ----------------------------------------------------------------------------
def _reference(x, wq, wk, wv, w_proj, b_proj):
    B, T, C = x.shape
    H, _, hs = wq.shape
    mask = jnp.tril(jnp.ones((T, T), dtype=bool))
    outs = []
    for h in range(H):
        q = x @ wq[h]
        k = x @ wk[h]
        v = x @ wv[h]
        wei = (q @ jnp.swapaxes(k, -2, -1)) * (C ** -0.5)
        wei = jnp.where(mask, wei, -jnp.inf)
        wei = jax.nn.softmax(wei, axis=-1)
        outs.append(wei @ v)
    cat = jnp.concatenate(outs, axis=-1)
    return cat @ w_proj + b_proj


if __name__ == "__main__":
    # config: n_embd=32, block_size=8, num_heads=4, head_size=8, dropout=0.0
    B, T, C = 2, 8, 32
    H, hs = 4, 8

    key = jax.random.PRNGKey(0)
    kx, kq, kk, kv, kp, kb = jax.random.split(key, 6)

    scale = 1.0 / math.sqrt(C)
    x = jax.random.normal(kx, (B, T, C), dtype=jnp.float32)
    wq = jax.random.normal(kq, (H, C, hs), dtype=jnp.float32) * scale
    wk = jax.random.normal(kk, (H, C, hs), dtype=jnp.float32) * scale
    wv = jax.random.normal(kv, (H, C, hs), dtype=jnp.float32) * scale
    w_proj = jax.random.normal(kp, (C, C), dtype=jnp.float32) * scale
    b_proj = jax.random.normal(kb, (C,), dtype=jnp.float32) * scale

    # Full-precision reference (force f32 matmuls so the reference itself is
    # not computed in bf16 MXU passes).
    with jax.default_matmul_precision("float32"):
        ref = _reference(x, wq, wk, wv, w_proj, b_proj)
    ref = jax.block_until_ready(ref)

    # 1) Exact f32 compute path: tight check that the fused kernel math
    #    (weight fold, batched heads, deferred-normalization softmax) is right.
    out_f32 = jax.block_until_ready(
        multi_head_attention(x, wq, wk, wv, w_proj, b_proj,
                             compute_dtype=jnp.float32))
    assert out_f32.shape == (B, T, C)
    assert jnp.allclose(out_f32, ref, atol=2e-3, rtol=2e-3), \
        "f32 kernel mismatch vs reference"

    # 2) Production bf16-MXU path (default): looser tolerance covers bf16
    #    input rounding (mantissa ~8 bits); softmax/accumulation stay f32.
    out_bf16 = jax.block_until_ready(
        multi_head_attention(x, wq, wk, wv, w_proj, b_proj))
    assert out_bf16.shape == (B, T, C)
    assert jnp.allclose(out_bf16, ref, atol=1e-1, rtol=1e-1), \
        "bf16 kernel mismatch vs reference"

    print("KERNEL_OK")
</pallas_src>

<mosaic_0001>
module attributes {stable_mosaic.version = 11 : i64} {
  func.func @_fused_mha_kernel(%arg0: i32, %arg1: memref<1x8x32xf32, #tpu.memory_space<vmem>>, %arg2: memref<32x96xf32, #tpu.memory_space<vmem>>, %arg3: memref<32x32xf32, #tpu.memory_space<vmem>>, %arg4: memref<1x32xf32, #tpu.memory_space<vmem>>, %arg5: memref<1x8x32xf32, #tpu.memory_space<vmem>>) attributes {dimension_semantics = [#tpu.dimension_semantics<parallel>], iteration_bounds = array<i64: 2>, scalar_prefetch = 0 : i64, scratch_operands = 0 : i64, tpu.core_type = #tpu.core_type<tc>, window_params = [{transform_indices = @transform_0, window_bounds = array<i64: 1, 8, 32>}, {pipeline_mode = #tpu.pipeline_mode<synchronous>, transform_indices = @transform_1, window_bounds = array<i64: 32, 96>}, {pipeline_mode = #tpu.pipeline_mode<synchronous>, transform_indices = @transform_2, window_bounds = array<i64: 32, 32>}, {pipeline_mode = #tpu.pipeline_mode<synchronous>, transform_indices = @transform_3, window_bounds = array<i64: 1, 32>}, {transform_indices = @transform_4, window_bounds = array<i64: 1, 8, 32>}]} {
    %c0 = arith.constant 0 : index
    %c0_0 = arith.constant 0 : index
    %c0_1 = arith.constant 0 : index
    %0 = vector.load %arg1[%c0, %c0_0, %c0_1] : memref<1x8x32xf32, #tpu.memory_space<vmem>>, vector<1x8x32xf32>
    %1 = vector.shape_cast %0 : vector<1x8x32xf32> to vector<8x32xf32>
    %c0_2 = arith.constant 0 : index
    %c0_3 = arith.constant 0 : index
    %2 = vector.load %arg2[%c0_2, %c0_3] : memref<32x96xf32, #tpu.memory_space<vmem>>, vector<32x96xf32>
    %c0_4 = arith.constant 0 : index
    %c0_5 = arith.constant 0 : index
    %3 = vector.load %arg3[%c0_4, %c0_5] : memref<32x32xf32, #tpu.memory_space<vmem>>, vector<32x32xf32>
    %c0_6 = arith.constant 0 : index
    %c0_7 = arith.constant 0 : index
    %4 = vector.load %arg4[%c0_6, %c0_7] : memref<1x32xf32, #tpu.memory_space<vmem>>, vector<1x32xf32>
    %cst = arith.constant dense<0.000000e+00> : vector<8x96xf32>
    %5 = tpu.matmul %1, %2, %cst {dimension_numbers = #tpu.dot_dimension_numbers<[1], [0], [0], [1], [0, 0, 1, 1], [], []>} : vector<8x32xf32>, vector<32x96xf32>, vector<8x96xf32> -> vector<8x96xf32>
    %6 = vector.extract_strided_slice %5 {offsets = [0, 0], sizes = [8, 32], strides = [1, 1]} : vector<8x96xf32> to vector<8x32xf32>
    %7 = vector.shape_cast %6 : vector<8x32xf32> to vector<8x4x8xf32>
    %8 = vector.extract_strided_slice %5 {offsets = [0, 32], sizes = [8, 32], strides = [1, 1]} : vector<8x96xf32> to vector<8x32xf32>
    %9 = vector.shape_cast %8 : vector<8x32xf32> to vector<8x4x8xf32>
    %10 = vector.extract_strided_slice %5 {offsets = [0, 64], sizes = [8, 32], strides = [1, 1]} : vector<8x96xf32> to vector<8x32xf32>
    %11 = vector.shape_cast %10 : vector<8x32xf32> to vector<8x4x8xf32>
    %cst_8 = arith.constant dense<0.000000e+00> : vector<4x8x8xf32>
    %12 = tpu.matmul %7, %9, %cst_8 {dimension_numbers = #tpu.dot_dimension_numbers<[2], [2], [0], [0], [0, 1, 0, 0, 1, 0], [1], [1]>} : vector<8x4x8xf32>, vector<8x4x8xf32>, vector<4x8x8xf32> -> vector<4x8x8xf32>
    %13 = tpu.iota {dimensions = array<i32: 0>} : vector<8x8xi32>
    %14 = tpu.iota {dimensions = array<i32: 1>} : vector<8x8xi32>
    %15 = arith.cmpi sle, %14, %13 : vector<8x8xi32>
    %16 = vector.shape_cast %15 : vector<8x8xi1> to vector<1x8x8xi1>
    %cst_9 = arith.constant -1.000000e+30 : f32
    %17 = vector.shape_cast %16 : vector<1x8x8xi1> to vector<1x8x8xi1>
    %18 = vector.broadcast %17 : vector<1x8x8xi1> to vector<4x8x8xi1>
    %19 = vector.broadcast %cst_9 : f32 to vector<4x8x8xf32>
    %20 = arith.select %18, %12, %19 : vector<4x8x8xi1>, vector<4x8x8xf32>
    %cst_10 = arith.constant dense<0xFF800000> : vector<4x8xf32>
    %21 = vector.multi_reduction <maximumf>, %20, %cst_10 [2] : vector<4x8x8xf32> to vector<4x8xf32>
    %22 = vector.shape_cast %21 : vector<4x8xf32> to vector<4x8x1xf32>
    %23 = vector.broadcast %22 : vector<4x8x1xf32> to vector<4x8x8xf32>
    %24 = arith.subf %20, %23 : vector<4x8x8xf32>
    %25 = math.exp %24 : vector<4x8x8xf32>
    %cst_11 = arith.constant dense<0.000000e+00> : vector<4x8xf32>
    %26 = vector.multi_reduction <add>, %25, %cst_11 [2] : vector<4x8x8xf32> to vector<4x8xf32>
    %27 = vector.shape_cast %26 : vector<4x8xf32> to vector<4x8x1xf32>
    %cst_12 = arith.constant dense<0.000000e+00> : vector<4x8x8xf32>
    %28 = tpu.matmul %25, %11, %cst_12 {dimension_numbers = #tpu.dot_dimension_numbers<[2], [0], [1], [2], [0, 0, 0, 1, 1, 2], [0], [1]>} : vector<4x8x8xf32>, vector<8x4x8xf32>, vector<4x8x8xf32> -> vector<4x8x8xf32>
    %cst_13 = arith.constant 1.000000e+00 : f32
    %29 = vector.broadcast %cst_13 : f32 to vector<4x8x1xf32>
    %30 = arith.divf %29, %27 : vector<4x8x1xf32>
    %31 = vector.broadcast %30 : vector<4x8x1xf32> to vector<4x8x8xf32>
    %32 = arith.mulf %28, %31 : vector<4x8x8xf32>
    %33 = tpu.transpose %32, [1, 0, 2] : vector<4x8x8xf32> -> vector<8x4x8xf32>
    %34 = vector.shape_cast %33 : vector<8x4x8xf32> to vector<8x32xf32>
    %cst_14 = arith.constant dense<0.000000e+00> : vector<8x32xf32>
    %35 = tpu.matmul %34, %3, %cst_14 {dimension_numbers = #tpu.dot_dimension_numbers<[1], [0], [0], [1], [0, 0, 1, 1], [], []>} : vector<8x32xf32>, vector<32x32xf32>, vector<8x32xf32> -> vector<8x32xf32>
    %36 = vector.broadcast %4 : vector<1x32xf32> to vector<8x32xf32>
    %37 = arith.addf %35, %36 : vector<8x32xf32>
    %c0_15 = arith.constant 0 : index
    %c0_16 = arith.constant 0 : index
    %c0_17 = arith.constant 0 : index
    %38 = vector.load %arg5[%c0_15, %c0_16, %c0_17] : memref<1x8x32xf32, #tpu.memory_space<vmem>>, vector<1x8x32xf32>
    %39 = vector.shape_cast %38 : vector<1x8x32xf32> to vector<8x32xf32>
    %40 = vector.shape_cast %37 : vector<8x32xf32> to vector<1x8x32xf32>
    tpu.vector_store %arg5[%c0_15, %c0_16, %c0_17], %40 {strides = array<i32>} : memref<1x8x32xf32, #tpu.memory_space<vmem>>, vector<1x8x32xf32>,
    return
  }
  func.func @transform_0(%arg0: i32) -> (i32, i32, i32) {
    %c0_i32 = arith.constant 0 : i32
    %c0_i32_0 = arith.constant 0 : i32
    %c0_i32_1 = arith.constant 0 : i32
    return %arg0, %c0_i32, %c0_i32_0 : i32, i32, i32
  }
  func.func @transform_1(%arg0: i32) -> (i32, i32) {
    %c0_i32 = arith.constant 0 : i32
    %c0_i32_0 = arith.constant 0 : i32
    %c0_i32_1 = arith.constant 0 : i32
    return %c0_i32, %c0_i32_0 : i32, i32
  }
  func.func @transform_2(%arg0: i32) -> (i32, i32) {
    %c0_i32 = arith.constant 0 : i32
    %c0_i32_0 = arith.constant 0 : i32
    %c0_i32_1 = arith.constant 0 : i32
    return %c0_i32, %c0_i32_0 : i32, i32
  }
  func.func @transform_3(%arg0: i32) -> (i32, i32) {
    %c0_i32 = arith.constant 0 : i32
    %c0_i32_0 = arith.constant 0 : i32
    %c0_i32_1 = arith.constant 0 : i32
    return %c0_i32, %c0_i32_0 : i32, i32
  }
  func.func @transform_4(%arg0: i32) -> (i32, i32, i32) {
    %c0_i32 = arith.constant 0 : i32
    %c0_i32_0 = arith.constant 0 : i32
    %c0_i32_1 = arith.constant 0 : i32
    return %arg0, %c0_i32, %c0_i32_0 : i32, i32, i32
  }
}

module attributes {stable_mosaic.version = 11 : i64} {
  func.func @_fused_mha_kernel(%arg0: i32, %arg1: memref<1x8x32xf32, #tpu.memory_space<vmem>>, %arg2: memref<32x96xf32, #tpu.memory_space<vmem>>, %arg3: memref<32x32xf32, #tpu.memory_space<vmem>>, %arg4: memref<1x32xf32, #tpu.memory_space<vmem>>, %arg5: memref<1x8x32xf32, #tpu.memory_space<vmem>>) attributes {dimension_semantics = [#tpu.dimension_semantics<parallel>], iteration_bounds = array<i64: 2>, scalar_prefetch = 0 : i64, scratch_operands = 0 : i64, tpu.core_type = #tpu.core_type<tc>, window_params = [{transform_indices = @transform_0, window_bounds = array<i64: 1, 8, 32>}, {pipeline_mode = #tpu.pipeline_mode<synchronous>, transform_indices = @transform_1, window_bounds = array<i64: 32, 96>}, {pipeline_mode = #tpu.pipeline_mode<synchronous>, transform_indices = @transform_2, window_bounds = array<i64: 32, 32>}, {pipeline_mode = #tpu.pipeline_mode<synchronous>, transform_indices = @transform_3, window_bounds = array<i64: 1, 32>}, {transform_indices = @transform_4, window_bounds = array<i64: 1, 8, 32>}]} {
    %c0 = arith.constant 0 : index
    %c0_0 = arith.constant 0 : index
    %c0_1 = arith.constant 0 : index
    %0 = vector.load %arg1[%c0, %c0_0, %c0_1] : memref<1x8x32xf32, #tpu.memory_space<vmem>>, vector<1x8x32xf32>
    %1 = vector.shape_cast %0 : vector<1x8x32xf32> to vector<8x32xf32>
    %c0_2 = arith.constant 0 : index
    %c0_3 = arith.constant 0 : index
    %2 = vector.load %arg2[%c0_2, %c0_3] : memref<32x96xf32, #tpu.memory_space<vmem>>, vector<32x96xf32>
    %c0_4 = arith.constant 0 : index
    %c0_5 = arith.constant 0 : index
    %3 = vector.load %arg3[%c0_4, %c0_5] : memref<32x32xf32, #tpu.memory_space<vmem>>, vector<32x32xf32>
    %c0_6 = arith.constant 0 : index
    %c0_7 = arith.constant 0 : index
    %4 = vector.load %arg4[%c0_6, %c0_7] : memref<1x32xf32, #tpu.memory_space<vmem>>, vector<1x32xf32>
    %cst = arith.constant dense<0.000000e+00> : vector<8x96xf32>
    %5 = tpu.matmul %1, %2, %cst {dimension_numbers = #tpu.dot_dimension_numbers<[1], [0], [0], [1], [0, 0, 1, 1], [], []>} : vector<8x32xf32>, vector<32x96xf32>, vector<8x96xf32> -> vector<8x96xf32>
    %6 = vector.extract_strided_slice %5 {offsets = [0, 0], sizes = [8, 32], strides = [1, 1]} : vector<8x96xf32> to vector<8x32xf32>
    %7 = vector.shape_cast %6 : vector<8x32xf32> to vector<8x4x8xf32>
    %8 = vector.extract_strided_slice %5 {offsets = [0, 32], sizes = [8, 32], strides = [1, 1]} : vector<8x96xf32> to vector<8x32xf32>
    %9 = vector.shape_cast %8 : vector<8x32xf32> to vector<8x4x8xf32>
    %10 = vector.extract_strided_slice %5 {offsets = [0, 64], sizes = [8, 32], strides = [1, 1]} : vector<8x96xf32> to vector<8x32xf32>
    %11 = vector.shape_cast %10 : vector<8x32xf32> to vector<8x4x8xf32>
    %cst_8 = arith.constant dense<0.000000e+00> : vector<4x8x8xf32>
    %12 = tpu.matmul %7, %9, %cst_8 {dimension_numbers = #tpu.dot_dimension_numbers<[2], [2], [0], [0], [0, 1, 0, 0, 1, 0], [1], [1]>} : vector<8x4x8xf32>, vector<8x4x8xf32>, vector<4x8x8xf32> -> vector<4x8x8xf32>
    %13 = tpu.iota {dimensions = array<i32: 0>} : vector<8x8xi32>
    %14 = tpu.iota {dimensions = array<i32: 1>} : vector<8x8xi32>
    %15 = arith.cmpi sle, %14, %13 : vector<8x8xi32>
    %16 = vector.shape_cast %15 : vector<8x8xi1> to vector<1x8x8xi1>
    %cst_9 = arith.constant -1.000000e+30 : f32
    %17 = vector.shape_cast %16 : vector<1x8x8xi1> to vector<1x8x8xi1>
    %18 = vector.broadcast %17 : vector<1x8x8xi1> to vector<4x8x8xi1>
    %19 = vector.broadcast %cst_9 : f32 to vector<4x8x8xf32>
    %20 = arith.select %18, %12, %19 : vector<4x8x8xi1>, vector<4x8x8xf32>
    %cst_10 = arith.constant dense<0xFF800000> : vector<4x8xf32>
    %21 = vector.multi_reduction <maximumf>, %20, %cst_10 [2] : vector<4x8x8xf32> to vector<4x8xf32>
    %22 = vector.shape_cast %21 : vector<4x8xf32> to vector<4x8x1xf32>
    %23 = vector.broadcast %22 : vector<4x8x1xf32> to vector<4x8x8xf32>
    %24 = arith.subf %20, %23 : vector<4x8x8xf32>
    %25 = math.exp %24 : vector<4x8x8xf32>
    %cst_11 = arith.constant dense<0.000000e+00> : vector<4x8xf32>
    %26 = vector.multi_reduction <add>, %25, %cst_11 [2] : vector<4x8x8xf32> to vector<4x8xf32>
    %27 = vector.shape_cast %26 : vector<4x8xf32> to vector<4x8x1xf32>
    %cst_12 = arith.constant dense<0.000000e+00> : vector<4x8x8xf32>
    %28 = tpu.matmul %25, %11, %cst_12 {dimension_numbers = #tpu.dot_dimension_numbers<[2], [0], [1], [2], [0, 0, 0, 1, 1, 2], [0], [1]>} : vector<4x8x8xf32>, vector<8x4x8xf32>, vector<4x8x8xf32> -> vector<4x8x8xf32>
    %cst_13 = arith.constant 1.000000e+00 : f32
    %29 = vector.broadcast %cst_13 : f32 to vector<4x8x1xf32>
    %30 = arith.divf %29, %27 : vector<4x8x1xf32>
    %31 = vector.broadcast %30 : vector<4x8x1xf32> to vector<4x8x8xf32>
    %32 = arith.mulf %28, %31 : vector<4x8x8xf32>
    %33 = tpu.transpose %32, [1, 0, 2] : vector<4x8x8xf32> -> vector<8x4x8xf32>
    %34 = vector.shape_cast %33 : vector<8x4x8xf32> to vector<8x32xf32>
    %cst_14 = arith.constant dense<0.000000e+00> : vector<8x32xf32>
    %35 = tpu.matmul %34, %3, %cst_14 {dimension_numbers = #tpu.dot_dimension_numbers<[1], [0], [0], [1], [0, 0, 1, 1], [], []>} : vector<8x32xf32>, vector<32x32xf32>, vector<8x32xf32> -> vector<8x32xf32>
    %36 = vector.broadcast %4 : vector<1x32xf32> to vector<8x32xf32>
    %37 = arith.addf %35, %36 : vector<8x32xf32>
    %c0_15 = arith.constant 0 : index
    %c0_16 = arith.constant 0 : index
    %c0_17 = arith.constant 0 : index
    %38 = vector.load %arg5[%c0_15, %c0_16, %c0_17] : memref<1x8x32xf32, #tpu.memory_space<vmem>>, vector<1x8x32xf32>
    %39 = vector.shape_cast %38 : vector<1x8x32xf32> to vector<8x32xf32>
    %40 = vector.shape_cast %37 : vector<8x32xf32> to vector<1x8x32xf32>
    tpu.vector_store %arg5[%c0_15, %c0_16, %c0_17], %40 {strides = array<i32>} : memref<1x8x32xf32, #tpu.memory_space<vmem>>, vector<1x8x32xf32>,
    return
  }
  func.func @transform_0(%arg0: i32) -> (i32, i32, i32) {
    %c0_i32 = arith.constant 0 : i32
    %c0_i32_0 = arith.constant 0 : i32
    %c0_i32_1 = arith.constant 0 : i32
    return %arg0, %c0_i32, %c0_i32_0 : i32, i32, i32
  }
  func.func @transform_1(%arg0: i32) -> (i32, i32) {
    %c0_i32 = arith.constant 0 : i32
    %c0_i32_0 = arith.constant 0 : i32
    %c0_i32_1 = arith.constant 0 : i32
    return %c0_i32, %c0_i32_0 : i32, i32
  }
  func.func @transform_2(%arg0: i32) -> (i32, i32) {
    %c0_i32 = arith.constant 0 : i32
    %c0_i32_0 = arith.constant 0 : i32
    %c0_i32_1 = arith.constant 0 : i32
    return %c0_i32, %c0_i32_0 : i32, i32
  }
  func.func @transform_3(%arg0: i32) -> (i32, i32) {
    %c0_i32 = arith.constant 0 : i32
    %c0_i32_0 = arith.constant 0 : i32
    %c0_i32_1 = arith.constant 0 : i32
    return %c0_i32, %c0_i32_0 : i32, i32
  }
  func.func @transform_4(%arg0: i32) -> (i32, i32, i32) {
    %c0_i32 = arith.constant 0 : i32
    %c0_i32_0 = arith.constant 0 : i32
    %c0_i32_1 = arith.constant 0 : i32
    return %arg0, %c0_i32, %c0_i32_0 : i32, i32, i32
  }
}

</mosaic_0001>

<bundles_post_ra>
// kernel: tpu_custom_call.1
= control target key start
LH: loop header
LB: loop body
LE: loop exit
PB: predicated region body
PF: predicated region fallthrough
CT: control target
= control target key end

     0   :  { %9 = vsyncpa [#allocation3], 0  ;;  %s2199_s0 = inlined_call_operand.hbm [shape: f32[2,8,32], index: 0, kind: input, shape index: {}]   ;;  %s2200_s1 = inlined_call_operand.hbm [shape: f32[32,96], index: 1, kind: input, shape index: {}]   ;;  %s2201_s2 = inlined_call_operand.hbm [shape: f32[32,32], index: 2, kind: input, shape index: {}]   ;;  %s2202_s3 = inlined_call_operand.vmem [shape: f32[1,32], index: 3, kind: input, shape index: {}]   ;;  %s2203_s4 = inlined_call_operand.hbm [shape: f32[2,8,32], index: 4, kind: output, shape index: {}]  }
   0x1   :  { %11 = vsyncpa [#allocation3 + $0x1], 0 }
   0x2   :  { %12 = vsyncpa [#allocation6], 0 }
   0x3   :  { %13 = vsyncpa [#allocation4], 0 }
   0x4   :  { %15 = vsyncpa [#allocation4 + $0x1], 0  ;;  %s1890_s15 = smov 0   ;;  %s1892_s16 = smov 0  }
   0x5   :  { %s1894_s17 = smov 0   ;;  %s1896_s18 = smov 0  }
   0x6 LB: > { %s1911_s19 = sadd.s32 4294967295, %s1844_s18   ;;  %s1461_s20 = sadd.s32 4294967294, %s1844_s18   ;;  %s1844_s18 = sphi %s1896_s18, %s2223_s18   ;;  %s1840_s17 = sphi %s1894_s17, %s2222_s17   ;;  %s1836_s16 = sphi %s1892_s16, %s2221_s16   ;;  %s1832_s15 = sphi %s1890_s15, %s2220_s15  }
   0x7   : > { %p41_p0 = scmp.ne.s32.totalorder %s1836_s16, %s1832_s15  ;;  %p2204_p1 = scmp.eq.s32.totalorder %s1911_s19, 0 }
   0x8   : > { %p134_p3 = scmp.eq.s32.totalorder %s1461_s20, 1  ;;  %p1462_p5 = scmp.ge.s32.totalorder %s1844_s18, 1 }
   0x9   : > { %p1920_p4 = por %p2204_p1, %p41_p0  ;;  %p141_p7 = scmp.lt.s32.totalorder %s1844_s18, 3 }
   0xa   : > { %p1925_p6 = por %p134_p3, %p41_p0  ;;  %s1846_s24 = smov [#allocation5]  }
   0xb   : > { %s2207_s21 = scalar_select %p1920_p4, 1, 0 }
   0xc   : > { %s2208_s22 = scalar_select %p1925_p6, 1, 0 }
   0xd   : > { %p1930_p8 = pnand %p1462_p5, %p141_p7  ;;  %s153_s25 = sshll.u32 %s1846_s24, 4  ;;  %s1934_s25 = int_to_ptr.vmem [resolvable:$true] %s153_s25 }
   0xe   : > { %s1847_s27 = smov [#allocation7]   ;;  %s1688_s5 = scalar_lea.hbm %s2200_s1, 512 }
   0xf   : > { %p1602_p9 = pneg %p1930_p8  ;;  %s166_s28 = sshll.u32 %s1847_s27, 4  ;;  %s1945_s28 = int_to_ptr.vmem [resolvable:$true] %s166_s28 }
  0x10   : > { %p1689_p12 = scmp.ne.s32.totalorder %s2200_s1, %s1688_s5  ;;  %p1695_p5 = scmp.lt.u32.totalorder %s1688_s5, %s2200_s1 }
  0x11   : > { %p1941_p11 = pnand %p1602_p9, %p2204_p1 }
  0x13   : > { %p1690_p13 = pneg %p1941_p11 }
  0x15   : > { %p1691_p0 = pnand %p1690_p13, %p1689_p12 }
  0x17   : > { %p1692_p3 = pneg %p1691_p0 }
  0x19   : > { %p1697_p7 = pnand %p1695_p5, %p1692_p3 }
  0x1b   : > { %1700 = shalt.err (!%p1697_p7)
}
  0x1c   : > { %s1701_s10 = scalar_lea.vmem %s1934_s25, 512  ;;  %p1709_p2 = scmp.lt.s32.totalorder %s1934_s25, %s1934_s25 }
  0x1d   : > { %p1702_p9 = scmp.ne.s32.totalorder %s1934_s25, %s1701_s10  ;;  %p1710_p12 = scmp.lt.s32.totalorder %s1701_s10, %s1701_s10 }
  0x1f   : > { %p1704_p10 = pnand %p1702_p9, %p1690_p13  ;;  %p1711_p0 = por %p1710_p12, %p1709_p2 }
  0x21   : > { %p1705_p1 = pneg %p1704_p10 }
  0x23   : > { %p1712_p6 = pnand %p1711_p0, %p1705_p1 }
  0x25   : > { %1715 = shalt.err (!%p1712_p6)
}
  0x26   : > { %s1848_s11 = smov 128   ;;  %s1849_s12 = smov 8  }
  0x27   : > { %1605 = dma.hbm_to_vmem [thread:$0]  (!%p1941_p11), %s2200_s1, 512, %s1934_s25, [#allocation6], %s1848_s11, %s1848_s11, %s1849_s12  }
  0x28   : > { %s1716_s27 = scalar_lea.hbm %s2201_s2, 512 }
  0x29   : > { %p1717_p2 = scmp.ne.s32.totalorder %s2201_s2, %s1716_s27  ;;  %p1723_p10 = scmp.lt.u32.totalorder %s1716_s27, %s2201_s2 }
  0x2b   : > { %p1719_p1 = pnand %p1717_p2, %p1690_p13 }
  0x2d   : > { %p1720_p6 = pneg %p1719_p1 }
  0x2f   : > { %p1725_p3 = pnand %p1723_p10, %p1720_p6 }
  0x31   : > { %1728 = shalt.err (!%p1725_p3)
}
  0x32   : > { %s1729_s25 = scalar_lea.vmem %s1945_s28, 512  ;;  %p1737_p12 = scmp.lt.s32.totalorder %s1945_s28, %s1945_s28 }
  0x33   : > { %p1730_p5 = scmp.ne.s32.totalorder %s1945_s28, %s1729_s25  ;;  %p1738_p0 = scmp.lt.s32.totalorder %s1729_s25, %s1729_s25 }
  0x35   : > { %p1732_p7 = pnand %p1730_p5, %p1690_p13  ;;  %p1739_p2 = por %p1738_p0, %p1737_p12 }
  0x37   : > { %p1733_p9 = pneg %p1732_p7 }
  0x39   : > { %p1740_p1 = pnand %p1739_p2, %p1733_p9 }
  0x3b   : > { %1743 = shalt.err (!%p1740_p1)
}
  0x3c   : > { %1608 = dma.hbm_to_vmem [thread:$0]  (!%p1941_p11), %s2201_s2, 512, %s1945_s28, [#allocation6], %s1848_s11, %s1848_s11, %s1849_s12  }
  0x3d   : > { %s2000_s9 = sadd.s32 1, %s1844_s18   ;;  %s28_s26 = sadd.s32 1, %s1840_s17 }
  0x3e   : > { %s25_s10 = ssub.s32 %s1844_s18, %s2000_s9  ;;  %p35_p13 = scmp.ne.s32.totalorder %s1840_s17, %s1836_s16 }
  0x3f   : > { %p26_p6 = scmp.eq.s32.totalorder %s25_s10, 0  ;;  %p36_p10 = scmp.eq.s32.totalorder %s1844_s18, 0 }
  0x40   : > { %p2211_p3 = scmp.eq.s32.totalorder %s1911_s19, 1  ;;  %p1619_p7 = scmp.lt.s32.totalorder %s1844_s18, 2 }
  0x41   : > { %s2016_s14 = scalar_select %p26_p6, %s1840_s17, %s28_s26  }
  0x42   : > { %p2010_p5 = por %p2211_p3, %p35_p13  ;;  %p37_p9 = por %p36_p10, %p35_p13 }
  0x43   : > { %s183_s20 = sand.u32 1, %s1840_s17   ;;  %s1467_s28 = sshll.u32 %s1844_s18, 7 }
  0x44   : > { %s2212_s13 = scalar_select %p2010_p5, 1, 0 }
  0x45   : > { %s1466_s24 = sshll.u32 %s183_s20, 3  ;;  %s2023_s27 = scalar_lea.hbm %s2199_s0, %s1467_s28 }
  0x46   : > { %s187_s29 = scalar_lea.vmem [#allocation2], %s1466_s24  ;;  %p2027_p11 = pnand %p1619_p7, %p37_p9 }
  0x47   : > { %s194_s30 = sshll.u32 %s187_s29, 4  ;;  %s184_s6 = scalar_lea.sflag [#allocation3], %s183_s20  ;;  %s2025_s30 = int_to_ptr.vmem [resolvable:$true] %s194_s30 }
  0x48   : > { %s1744_s25 = scalar_lea.hbm %s2023_s27, 128  ;;  %p1746_p0 = pneg %p2027_p11 }
  0x49   : > { %p1745_p12 = scmp.ne.s32.totalorder %s2023_s27, %s1744_s25  ;;  %s1749_s26 = scalar_lea.hbm %s2199_s0, 256 }
  0x4a   : > { %p1750_p13 = scmp.lt.u32.totalorder %s2023_s27, %s2199_s0  ;;  %p1751_p6 = scmp.lt.u32.totalorder %s1749_s26, %s1744_s25 }
  0x4b   : > { %p1747_p2 = pnand %p1746_p0, %p1745_p12  ;;  %p1753_p3 = scmp.lt.u32.totalorder %s1744_s25, %s2023_s27 }
  0x4c   : > { %p1752_p10 = por %p1751_p6, %p1750_p13 }
  0x4d   : > { %p1748_p1 = pneg %p1747_p2 }
  0x4e   : > { %p1754_p7 = por %p1753_p3, %p1752_p10 }
  0x50   : > { %p1755_p9 = pnand %p1754_p7, %p1748_p1 }
  0x52   : > { %1758 = shalt.err (!%p1755_p9)
}
  0x53   : > { %s1759_s20 = scalar_lea.vmem %s2025_s30, 128  ;;  %s1850_s28 = smov [#allocation2]  }
  0x54   : > { %p1760_p12 = scmp.ne.s32.totalorder %s2025_s30, %s1759_s20  ;;  %s1764_s11 = sshll.u32 %s1850_s28, 4  ;;  %s1765_s11 = int_to_ptr.vmem [resolvable:$false] %s1764_s11 }
  0x55   : > { %s1766_s12 = scalar_lea.vmem %s1765_s11, 256  ;;  %p1767_p4 = scmp.lt.s32.totalorder %s2025_s30, %s1765_s11 }
  0x56   : > { %p1762_p2 = pnand %p1760_p12, %p1746_p0  ;;  %p1768_p13 = scmp.lt.s32.totalorder %s1766_s12, %s1759_s20 }
  0x58   : > { %p1763_p5 = pneg %p1762_p2  ;;  %p1769_p6 = por %p1768_p13, %p1767_p4 }
  0x5a   : > { %p1770_p10 = pnand %p1769_p6, %p1763_p5 }
  0x5c   : > { %1773 = shalt.err (!%p1770_p10)
}
  0x5d   : > { %1612 = dma.hbm_to_vmem [thread:$0]  (!%p2027_p11), %s2023_s27, 128, %s2025_s30, %s184_s6  }
  0x5e   : > { %203 = sbr.rel (%p1930_p8) target bundleno = 1650 (0x672), region = 36  ;;  %s2059_s29 = sand.u32 (!%p1930_p8), 1, %s1836_s16  }
  0x5f   : > { %s1469_s25 = sshll.u32 (!%p1930_p8), %s2059_s29, 3  ;;  %s206_s7 = scalar_lea.sflag (!%p1930_p8), [#allocation3], %s2059_s29 }
  0x60   : > { %s209_s8 = scalar_lea.vmem (!%p1930_p8), [#allocation2], %s1469_s25  ;;  %p2214_p4 = scmp.ne.s32.totalorder (!%p1930_p8), %s2207_s21, 0 }
  0x65   : > { %1819 = dma.done.wait (%p2214_p4), %s206_s7, 128  }
  0x66   : > { %1821 = vsyncadd (%p2214_p4), %s206_s7, 4294967168  ;;  %p2215_p5 = scmp.eq.s32.totalorder %s1911_s19, 0 }
  0x68   : > { %1823 = dma.done.wait (%p2215_p5), [#allocation6], 1024   ;;  %p2216_p8 = pmov %p2215_p5 }
  0x69   : > { %v1851_v0 = vmov 0.0|0.0   ;;  %vm1852_vm0 = vmmov 0   ;;  %v1853_v1 = vmov 0.0   ;;  %v243_v2 = vld [vmem:[#allocation5] sm:$0xff]  ;;  %v244_v3 = vld [vmem:[#allocation5 + $0x8] sm:$0xff]  ;;  %v245_v4 = vld [vmem:[#allocation5 + $0x10] sm:$0xff]  ;;  %v762_v22 = vlaneseq }
  0x6a   : > { %1825 = vsyncadd (%p2216_p8), [#allocation6], 4294966272  ;;  %1578 = vmatprep.subr.bf16.mxu0 %v1851_v0  ;;  %1524 = vmatprep.mubr.msk.f32.mxu0 %vm1852_vm0, %v1853_v1  ;;  %v1579_v5 = vpack.c.bf16 %v244_v3, %v243_v2  ;;  %v246_v6 = vld [vmem:[#allocation5 + $0x18] sm:$0xff]  ;;  %vm252_vm1 = vcmask 261120   ;;  %s1854_s21 = smov 104   ;;  %s1855_s23 = smov 120  }
  0x6b   : > { %1532 = vmatprep.subr.mxu1 %v1853_v1  ;;  %1534 = vmatprep.mubr.msk.f32.mxu1 %vm1852_vm0, %v1853_v1  ;;  %v1582_v7 = vpack.c.bf16 %v246_v6, %v245_v4  ;;  %v242_v8 = vld [vmem:[%s209_s8] sm:$0xff]  ;;  %s1856_s27 = smov 96   ;;  %s1857_s30 = smov 112   ;;  %vm473_vm2 = vcmask 64512   ;;  %v2107_v23 = vshrl.u32 %v762_v22, 7  ;;  %v765_v24 = vand.u32 127, %v762_v22 }
  0x6c   : > { %1580 = vmatpush3.bf16.msra.mxu0 %v1579_v5  ;;  %s1858_s5 = smov 64   ;;  %v247_v3 = vld [vmem:[#allocation7] sm:$0xff]  ;;  %v248_v4 = vld [vmem:[#allocation7 + $0x8] sm:$0xff]  ;;  %s1861_s6 = smov 16   ;;  %vm1274_vm4 = vcmask 130048   ;;  %vm1276_vm5 = vcmask 195584  }
  0x6d   : > { %1581 = vmatprep.subr.bf16.mxu0 %v1851_v0  ;;  %vm766_vm3 = vcmp.le.s32.totalorder %v765_v24, %v2107_v23  ;;  %v1585_v5 = vpack.c.bf16 %v248_v4, %v247_v3  ;;  %s1862_s26 = smov 8   ;;  %s1863_s10 = smov 24  }
  0x6e   : > { %s1487_s28 = sshll.u32 %s1911_s19, 7  ;;  %s241_s11 = scalar_lea.vmem [#allocation8], %s1469_s25 }
  0x6f   : > { %s1372_s12 = sshll.u32 %s241_s11, 4  ;;  %p2217_p0 = scmp.ne.s32.totalorder %s2212_s13, 0  ;;  %s2156_s12 = int_to_ptr.vmem [resolvable:$true] %s1372_s12 }
  0x70   : > { %1583 = vmatpush3.bf16.msra.mxu0 %v1582_v7  ;;  %s1774_s19 = scalar_lea.vmem %s2156_s12, 128  ;;  %s1864_s25 = smov [#allocation8]  }
  0x71   : > { %1527 = vmatprep.subr.mxu0 %v1853_v1  ;;  %p1775_p11 = scmp.ne.s32.totalorder %s2156_s12, %s1774_s19 }
  0x73   : > { %1525 = vmatmul.mubr.msk.f32.vlgmr.msra.gmra.mrb[0].mxu0 %vm252_vm1, %v242_v8  ;;  %p1776_p1 = pnand %p1775_p11, %p2217_p0 }
  0x74   : > { %1529 = vmatprep.mubr.msk.f32.mxu0 %vm1852_vm0, %v1853_v1 }
  0x75   : > { %p1777_p3 = pneg %p1776_p1 }
 0x146   : > { %v2084_v9 = vpop.f32.mrb[0].mxu0 }
 0x147   : > { %331 = vrot.lane.b32.xlu1 %v2084_v9, %s1854_s21  ;;  %327 = vrot.lane.b32.xlu0 %v2084_v9, %s1855_s23  ;;  %v1526_v10 = vpop.f32.mrb[1].mxu0  ;;  %s2154_s21 = scalar_lea.hbm %s2203_s4, %s1487_s28  ;;  %s1359_s23 = scalar_lea.sflag [#allocation4], %s2059_s29 }
 0x14b   : > { %333 = vrot.lane.b32.xlu1 %v2084_v9, %s1856_s27  ;;  %329 = vrot.lane.b32.xlu0 %v2084_v9, %s1857_s30 }
 0x1b9   : > { %v328_v11 = vpop.permute.xlu0 %327  ;;  %v332_v12 = vpop.permute.xlu1 %331 }
 0x1ba   : > { %335 = vrot.lane.b32.xlu0 %v328_v11, %s1856_s27 }
 0x1bd   : > { %v330_v13 = vpop.permute.xlu0 %329  ;;  %v334_v14 = vpop.permute.xlu1 %333 }
 0x1be   : > { %339 = vrot.lane.b32.xlu0 %v332_v12, %s1856_s27  ;;  %337 = vrot.lane.b32.xlu1 %v330_v13, %s1856_s27  ;;  %s1778_s27 = sshll.u32 %s1864_s25, 4  ;;  %s1779_s27 = int_to_ptr.vmem [resolvable:$false] %s1778_s27 }
 0x1bf   : > { %s1780_s30 = scalar_lea.vmem %s1779_s27, 256  ;;  %p1781_p7 = scmp.lt.s32.totalorder %s2156_s12, %s1779_s27 }
 0x1c0   : > { %p1782_p9 = scmp.lt.s32.totalorder %s1780_s30, %s1774_s19 }
 0x1c2   : > { %p1783_p12 = por %p1782_p9, %p1781_p7 }
 0x1c4   : > { %p1784_p2 = pnand %p1783_p12, %p1777_p3 }
 0x1e7   : > { %345 = vxpose.xlu1.b32.start.end [1/1] (short) (narrow) %v334_v14, 8 }
 0x22c   : > { %v336_v15 = vpop.permute.xlu0 %335 }
 0x22d   : > { %377 = vxpose.xlu0.b32.start.end [1/1] (short) (narrow) %v336_v15, 8 }
 0x230   : > { %v338_v16 = vpop.permute.xlu1 %337  ;;  %v340_v17 = vpop.permute.xlu0 %339 }
 0x231   : > { %409 = vxpose.xlu0.b32.start.end [1/1] (short) (narrow) %v338_v16, 8 }
 0x235   : > { %441 = vxpose.xlu0.b32.start.end [1/1] (short) (narrow) %v340_v17, 8 }
 0x267   : > { %v361_v18 = vpop.trf.xlu1 }
 0x268   : > { %1528 = vmatpush3.msra.mxu0 %v361_v18  ;;  %v1860_v18 = vmov 1934713408  }
 0x269   : > { %1530 = vmatmul.mubr.msk.f32.vlgmr.msra.gmra.mrb[2].mxu0 %vm473_vm2, %v2084_v9  ;;  %1542 = vmatprep.subr.mxu0 %v1853_v1 }
 0x26a   : > { %1544 = vmatprep.mubr.msk.f32.mxu0 %vm1852_vm0, %v1853_v1 }
 0x2ad   : > { %v393_v19 = vpop.trf.xlu0 }
 0x2ae   : > { %1533 = vmatpush3.msra.mxu1 %v393_v19  ;;  %v1160_v19 = vunpack.c.l.s4 %v1860_v18 }
 0x2af   : > { %1535 = vmatmul.mubr.msk.f32.vlgmr.msra.gmra.mrb[0].mxu1 %vm473_vm2, %v328_v11  ;;  %1537 = vmatprep.subr.mxu1 %v1853_v1 }
 0x2b0   : > { %1539 = vmatprep.mubr.msk.f32.mxu1 %vm1852_vm0, %v1853_v1 }
 0x2b1   : > { %v425_v20 = vpop.trf.xlu0 }
 0x2b2   : > { %1538 = vmatpush3.msra.mxu1 %v425_v20 }
 0x2b3   : > { %1540 = vmatmul.mubr.msk.f32.vlgmr.msra.gmra.mrb[2].mxu1 %vm473_vm2, %v330_v13  ;;  %1547 = vmatprep.subr.mxu1 %v1853_v1 }
 0x2b4   : > { %1549 = vmatprep.mubr.msk.f32.mxu1 %vm1852_vm0, %v1853_v1 }
 0x2b5   : > { %v457_v21 = vpop.trf.xlu0 }
 0x2b6   : > { %1543 = vmatpush3.msra.mxu0 %v457_v21 }
 0x2b7   : > { %1545 = vmatmul.mubr.msk.f32.vlgmr.msra.gmra.mrb[4].mxu0 %vm473_vm2, %v332_v12  ;;  %1552 = vmatprep.subr.mxu0 %v1853_v1 }
 0x2b8   : > { %1554 = vmatprep.mubr.msk.f32.mxu0 %vm1852_vm0, %v1853_v1 }
 0x33c   : > { %v542_v25 = vpop.f32.mrb[2].mxu0 }
 0x33d   : > { %v769_v26 = vsel %vm766_vm3, %v542_v25, -1e+30  ;;  %v1531_v27 = vpop.f32.mrb[3].mxu0 }
 0x33e   : > { %v773_v28 = vsel %vm473_vm2, %v769_v26, -inf }
 0x33f   : > { %774 = vmax.xlane.f32.xlu1 %v773_v28 }
 0x350   : > { %885 = vrot.lane.b32.xlu1 %v328_v11, %s1858_s5 }
 0x382   : > { %v614_v29 = vpop.f32.mrb[0].mxu1 }
 0x383   : > { %v770_v30 = vsel %vm766_vm3, %v614_v29, -1e+30  ;;  %v1536_v31 = vpop.f32.mrb[1].mxu1  ;;  %v1161_v29 = vunpack.c.0.s8 %v1160_v19 }
 0x384   : > { %v776_v32 = vsel %vm473_vm2, %v770_v30, -inf }
 0x385   : > { %777 = vmax.xlane.f32.xlu0 %v776_v32 }
 0x386   : > { %v686_v33 = vpop.f32.mrb[2].mxu1 }
 0x387   : > { %v1541_v34 = vpop.f32.mrb[3].mxu1  ;;  %v771_v39 = vsel %vm766_vm3, %v686_v33, -1e+30 }
 0x388   : > { %v779_v40 = vsel %vm473_vm2, %v771_v39, -inf }
 0x38a   : > { %v758_v35 = vpop.f32.mrb[4].mxu0 }
 0x38b   : > { %v772_v36 = vsel %vm766_vm3, %v758_v35, -1e+30  ;;  %v1546_v37 = vpop.f32.mrb[5].mxu0 }
 0x38c   : > { %v782_v38 = vsel %vm473_vm2, %v772_v36, -inf }
 0x38d   : > { %783 = vmax.xlane.f32.xlu1 %v782_v38  ;;  %v1164_v38 = vsub.s32 %v1161_v29, %v2107_v23 }
 0x391   : > { %780 = vmax.xlane.f32.xlu1 %v779_v40 }
 0x39b   : > { %809 = vrot.lane.b32.xlu0 %v2084_v9, %s1858_s5 }
 0x39f   : > { %1037 = vrot.lane.b32.xlu0 %v332_v12, %s1858_s5 }
 0x3a2   : > { %961 = vrot.lane.b32.xlu1 %v330_v13, %s1858_s5  ;;  %v1859_v13 = vmov 1983009808  }
 0x3a3   : > { %v1128_v14 = vunpack.c.l.s4 %v1859_v13 }
 0x3cc   : > { %v775_v41 = vpop.xlane.xlu1 %774 }
 0x3cd   : > { %v785_v42 = vsub.f32 %v769_v26, %v775_v41 }
 0x3cf   : > { %v789_v43 = vmul.f32 1.442695, %v785_v42 }
 0x3d0   : > { %v886_v44 = vpop.permute.xlu1 %885 }
 0x3d1   : > { %1672 = vpow2.f32 %v789_v43  ;;  %1553 = vmatpush3.msra.mxu0 %v886_v44 }
 0x3d2   : > { %1562 = vmatprep.subr.mxu0 %v1853_v1 }
 0x3db   : > { %v1673_v45 = vpop.eup %1672 }
 0x3dc   : > { %v797_v46 = vsel %vm473_vm2, %v1673_v45, 0.0 }
 0x3dd   : > { %798 = vadd.xlane.f32.xlu1 %v797_v46  ;;  %v250_v46 = vld [vmem:[#allocation7 + $0x18] sm:$0xff] }
 0x412   : > { %v778_v47 = vpop.xlane.xlu0 %777 }
 0x413   : > { %v786_v48 = vsub.f32 %v770_v30, %v778_v47 }
 0x415   : > { %v791_v49 = vmul.f32 1.442695, %v786_v48 }
 0x416   : > { %v810_v50 = vpop.permute.xlu0 %809 }
 0x417   : > { %1674 = vpow2.f32 %v791_v49  ;;  %1548 = vmatpush3.msra.mxu1 %v810_v50 }
 0x418   : > { %1550 = vmatmul.mubr.msk.f32.vlgmr.msra.gmra.mrb[4].mxu1 %vm473_vm2, %v1673_v45  ;;  %1557 = vmatprep.subr.mxu1 %v1853_v1  ;;  %v249_v45 = vld [vmem:[#allocation7 + $0x10] sm:$0xff] }
 0x419   : > { %1559 = vmatprep.mubr.msk.f32.mxu1 %vm1852_vm0, %v1853_v1 }
 0x41a   : > { %v784_v51 = vpop.xlane.xlu1 %783  ;;  %v1038_v58 = vpop.permute.xlu0 %1037 }
 0x41b   : > { %v788_v52 = vsub.f32 %v772_v36, %v784_v51  ;;  %v1588_v51 = vpack.c.bf16 %v250_v46, %v249_v45 }
 0x41d   : > { %v795_v53 = vmul.f32 1.442695, %v788_v52 }
 0x41e   : > { %v781_v54 = vpop.xlane.xlu1 %780 }
 0x41f   : > { %1676 = vpow2.f32 %v795_v53  ;;  %v787_v55 = vsub.f32 %v771_v39, %v781_v54 }
 0x421   : > { %v1675_v56 = vpop.eup %1674  ;;  %v793_v57 = vmul.f32 1.442695, %v787_v55 }
 0x422   : > { %1555 = vmatmul.mubr.msk.f32.vlgmr.msra.gmra.mrb[6].mxu0 %vm473_vm2, %v1675_v56  ;;  %v962_v59 = vpop.permute.xlu1 %961  ;;  %v800_v60 = vsel %vm473_vm2, %v1675_v56, 0.0 }
 0x423   : > { %1678 = vpow2.f32 %v793_v57  ;;  %1563 = vmatpush3.msra.mxu0 %v1038_v58  ;;  %801 = vadd.xlane.f32.xlu0 %v800_v60 }
 0x424   : > { %1558 = vmatpush3.msra.mxu1 %v962_v59  ;;  %1564 = vmatprep.mubr.msk.f32.mxu0 %vm1852_vm0, %v1853_v1 }
 0x425   : > { %1584 = vmatprep.subr.bf16.mxu1 %v1851_v0 }
 0x429   : > { %v1677_v61 = vpop.eup %1676 }
 0x42a   : > { %1565 = vmatmul.mubr.msk.f32.vlgmr.msra.gmra.mrb[8].mxu0 %vm473_vm2, %v1677_v61  ;;  %v806_v62 = vsel %vm473_vm2, %v1677_v61, 0.0 }
 0x42b   : > { %807 = vadd.xlane.f32.xlu1 %v806_v62 }
 0x42d   : > { %v1679_v63 = vpop.eup %1678 }
 0x42e   : > { %1560 = vmatmul.mubr.msk.f32.vlgmr.msra.gmra.mrb[6].mxu1 %vm473_vm2, %v1679_v63  ;;  %v803_v2 = vsel %vm473_vm2, %v1679_v63, 0.0 }
 0x42f   : > { %804 = vadd.xlane.f32.xlu0 %v803_v2  ;;  %1575 = vmatprep.mubr.msk.f32.mxu1 %vm1852_vm0, %v1853_v1  ;;  %v1129_v1 = vunpack.c.0.s8 %v1128_v14 }
 0x430   : > { %1586 = vmatpush3.bf16.msra.mxu1 %v1585_v5 }
 0x431   : > { %1587 = vmatprep.subr.bf16.mxu1 %v1851_v0  ;;  %v1132_v20 = vsub.s32 %v1129_v1, %v2107_v23 }
 0x434   : > { %1589 = vmatpush3.bf16.msra.mxu1 %v1588_v51 }
 0x46a   : > { %v799_v7 = vpop.xlane.xlu1 %798 }
 0x4b0   : > { %v802_v9 = vpop.xlane.xlu0 %801 }
 0x4b1   : > { %1680 = vrcp.f32 %v802_v9 }
 0x4b8   : > { %v808_v10 = vpop.xlane.xlu1 %807 }
 0x4b9   : > { %1682 = vrcp.f32 %v808_v10 }
 0x4ba   : > { %1684 = vrcp.f32 %v799_v7 }
 0x4bb   : > { %v1681_v16 = vpop.eup %1680 }
 0x4bc   : > { %v805_v11 = vpop.xlane.xlu0 %804 }
 0x4bd   : > { %1686 = vrcp.f32 %v805_v11 }
 0x4c3   : > { %v1683_v17 = vpop.eup %1682 }
 0x4c4   : > { %v1685_v25 = vpop.eup %1684 }
 0x4c7   : > { %v1687_v28 = vpop.eup %1686 }
 0x4eb   : > { %v881_v6 = vpop.f32.mrb[4].mxu1 }
 0x4ec   : > { %v1551_v8 = vpop.f32.mrb[5].mxu1  ;;  %v1121_v31 = vmul.f32 %v1685_v25, %v881_v6 }
 0x4f5   : > { %v957_v12 = vpop.f32.mrb[6].mxu0 }
 0x4f6   : > { %v1556_v15 = vpop.f32.mrb[7].mxu0  ;;  %v1122_v21 = vmul.f32 %v1681_v16, %v957_v12 }
 0x4f7   : > { %v1484_v15 = vld [vmem:[%s2202_s3] ss:$0 sm:$0xff] }
 0x4fd   : > { %v1109_v0 = vpop.f32.mrb[8].mxu0 }
 0x4fe   : > { %v1124_v22 = vmul.f32 %v1683_v17, %v1109_v0  ;;  %v1566_v24 = vpop.f32.mrb[9].mxu0 }
 0x500   : > { %v1141_v26 = vcombine.low %v1122_v21, %v1124_v22  ;;  %v1142_v27 = vcombine.high %v1122_v21, %v1124_v22 }
 0x501   : > { %v1033_v30 = vpop.f32.mrb[6].mxu1 }
 0x502   : > { %v1149_v32 = vrot.slane %v1141_v26, %v1132_v20  ;;  %v1156_v33 = vrot.slane %v1142_v27, %v1132_v20  ;;  %v1123_v34 = vmul.f32 %v1687_v28, %v1033_v30  ;;  %v1561_v35 = vpop.f32.mrb[7].mxu1 }
 0x504   : > { %v1125_v36 = vcombine.low %v1121_v31, %v1123_v34  ;;  %v1126_v37 = vcombine.high %v1121_v31, %v1123_v34 }
 0x506   : > { %v1133_v39 = vrot.slane %v1125_v36, %v1132_v20  ;;  %v1140_v40 = vrot.slane %v1126_v37, %v1132_v20 }
 0x508   : > { %v1157_v41 = vcombine.low %v1133_v39, %v1149_v32  ;;  %v1158_v42 = vcombine.high %v1133_v39, %v1149_v32  ;;  %v1173_v43 = vcombine.low %v1140_v40, %v1156_v33  ;;  %v1174_v44 = vcombine.high %v1140_v40, %v1156_v33 }
 0x50a   : > { %v1165_v47 = vrot.slane %v1157_v41, %v1164_v38  ;;  %v1172_v48 = vrot.slane %v1158_v42, %v1164_v38  ;;  %v1181_v49 = vrot.slane %v1173_v43, %v1164_v38  ;;  %v1188_v50 = vrot.slane %v1174_v44, %v1164_v38 }
 0x50c   : > { %v1193_v52 = vcombine.low %v1165_v47, %v1172_v48  ;;  %v1482_v53 = vcombine.high %v1165_v47, %v1172_v48  ;;  %v1209_v54 = vcombine.low %v1181_v49, %v1188_v50  ;;  %v1483_v55 = vcombine.high %v1181_v49, %v1188_v50 }
 0x50e   : > { %v1200_v56 = vrot.slane %v1193_v52, %v1132_v20  ;;  %v1208_v23 = vrot.slane %v1482_v53, %v1132_v20  ;;  %v1216_v57 = vrot.slane %v1209_v54, %v1132_v20  ;;  %v1224_v58 = vrot.slane %v1483_v55, %v1132_v20 }
 0x510   : > { %v1226_v59 = vcombine.high %v1200_v56, %v1208_v23  ;;  %v1242_v60 = vcombine.high %v1216_v57, %v1224_v58  ;;  %v1225_v61 = vcombine.low %v1200_v56, %v1208_v23  ;;  %v1241_v62 = vcombine.low %v1216_v57, %v1224_v58 }
 0x512   : > { %v1240_v63 = vrot.slane %v1226_v59, %v1164_v38  ;;  %v1256_v2 = vrot.slane %v1242_v60, %v1164_v38  ;;  %v1233_v3 = vrot.slane %v1225_v61, %v1164_v38  ;;  %v1249_v4 = vrot.slane %v1241_v62, %v1164_v38 }
 0x514   : > { %v1259_v5 = vcombine.low %v1240_v63, %v1256_v2  ;;  %v1258_v6 = vcombine.high %v1233_v3, %v1249_v4  ;;  %v1260_v7 = vcombine.high %v1240_v63, %v1256_v2  ;;  %v1257_v8 = vcombine.low %v1233_v3, %v1249_v4 }
 0x516   : > { %1266 = vrot.lane.b32.xlu1 %v1259_v5, %s1861_s6  ;;  %1262 = vrot.lane.b32.xlu0 %v1258_v6, %s1862_s26 }
 0x51a   : > { %1270 = vrot.lane.b32.xlu1 %v1260_v7, %s1863_s10 }
 0x588   : > { %v1267_v9 = vpop.permute.xlu1 %1266  ;;  %v1263_v10 = vpop.permute.xlu0 %1262 }
 0x589   : > { %v1273_v11 = vsel %vm473_vm2, %v1257_v8, %v1263_v10 }
 0x58a   : > { %v1275_v13 = vsel %vm1274_vm4, %v1273_v11, %v1267_v9 }
 0x58c   : > { %v1271_v12 = vpop.permute.xlu1 %1270 }
 0x58d   : > { %v1277_v14 = vsel %vm1276_vm5, %v1275_v13, %v1271_v12 }
 0x58e   : > { %1576 = vmatmul.mubr.msk.f32.vlgmr.msra.gmra.mrb[8].mxu1 %vm252_vm1, %v1277_v14 }
 0x661   : > { %v1353_v1 = vpop.f32.mrb[8].mxu1 }
 0x662   : > { %v1354_v16 = vadd.f32 %v1484_v15, %v1353_v1  ;;  %v1577_v17 = vpop.f32.mrb[9].mxu1 }
 0x664   : > { %1357 = vst.msk [vmem:[%s241_s11] sm:$0xff] %vm252_vm1, %v1354_v16 }
 0x665   : > { %1787 = shalt.err (!%p1784_p2)
}
 0x666   : > { %s1788_s29 = scalar_lea.hbm %s2154_s21, 128  ;;  %s1792_s26 = scalar_lea.hbm %s2203_s4, 256 }
 0x667   : > { %p1789_p13 = scmp.ne.s32.totalorder %s2154_s21, %s1788_s29  ;;  %p1793_p4 = scmp.lt.u32.totalorder %s2154_s21, %s2203_s4 }
 0x668   : > { %p1794_p5 = scmp.lt.u32.totalorder %s1792_s26, %s1788_s29  ;;  %p1796_p11 = scmp.lt.u32.totalorder %s1788_s29, %s2154_s21 }
 0x669   : > { %p1790_p6 = pnand %p1789_p13, %p2217_p0 }
 0x66a   : > { %p1795_p8 = por %p1794_p5, %p1793_p4 }
 0x66b   : > { %p1791_p10 = pneg %p1790_p6 }
 0x66c   : > { %p1797_p1 = por %p1796_p11, %p1795_p8 }
 0x66e   : > { %p1798_p3 = pnand %p1797_p1, %p1791_p10 }
 0x670   : > { %1801 = shalt.err (!%p1798_p3)
}
 0x671   : > { %1600 = dma.vmem_to_hbm [thread:$0]  (%p2217_p0), %s2156_s12, 128, %s2154_s21, %s1359_s23  }
 0x672 PF: > { %s1384_s20 = sand.u32 1, %s1832_s15   ;;  %p2218_p7 = scmp.ne.s32.totalorder %s2208_s22, 0 }
 0x673   : > { %p2219_p9 = scmp.ge.s32.totalorder %s1844_s18, 2  ;;  %s1385_s28 = scalar_lea.sflag [#allocation4], %s1384_s20 }
 0x675   : > { %p1614_p12 = pnand %p2219_p9, %p2218_p7 }
 0x677   : > { %1827 = dma.done.wait (!%p1614_p12), %s1385_s28, 128  }
 0x678   : > { %1829 = vsyncadd (!%p1614_p12), %s1385_s28, 4294967168  ;;  %p18_p2 = scmp.ge.s32.totalorder %s2000_s9, 4   ;;  %s2220_s15 = smov %s1836_s16 }
 0x679   : > { %s2221_s16 = smov %s1840_s17  ;;  %s2222_s17 = smov %s2016_s14 }
 0x67a   : > { %s2223_s18 = smov %s2000_s9  ;;  %20 = sbr.rel (!%p18_p2) target bundleno = 6 (0x6), region = 89 }
 0x681   :  { %1390 = vsyncpa [#allocation3], 1 }
 0x682   :  { %1392 = vsyncpa [#allocation3 + $0x1], 1 }
 0x683   :  { %1393 = vsyncpa [#allocation6], 1 }
 0x684   :  { %1394 = vsyncpa [#allocation4], 1 }
 0x685   :  { %1396 = vsyncpa [#allocation4 + $0x1], 1 }

// kernel: tpu_custom_call.1
= control target key start
LH: loop header
LB: loop body
LE: loop exit
PB: predicated region body
PF: predicated region fallthrough
CT: control target
= control target key end

     0   :  { %9 = vsyncpa [#allocation3], 0  ;;  %s2199_s0 = inlined_call_operand.hbm [shape: f32[2,8,32], index: 0, kind: input, shape index: {}]   ;;  %s2200_s1 = inlined_call_operand.hbm [shape: f32[32,96], index: 1, kind: input, shape index: {}]   ;;  %s2201_s2 = inlined_call_operand.hbm [shape: f32[32,32], index: 2, kind: input, shape index: {}]   ;;  %s2202_s3 = inlined_call_operand.vmem [shape: f32[1,32], index: 3, kind: input, shape index: {}]   ;;  %s2203_s4 = inlined_call_operand.hbm [shape: f32[2,8,32], index: 4, kind: output, shape index: {}]  }
   0x1   :  { %11 = vsyncpa [#allocation3 + $0x1], 0 }
   0x2   :  { %12 = vsyncpa [#allocation6], 0 }
   0x3   :  { %13 = vsyncpa [#allocation4], 0 }
   0x4   :  { %15 = vsyncpa [#allocation4 + $0x1], 0  ;;  %s1890_s15 = smov 0   ;;  %s1892_s16 = smov 0  }
   0x5   :  { %s1894_s17 = smov 0   ;;  %s1896_s18 = smov 0  }
   0x6 LB: > { %s1911_s19 = sadd.s32 4294967295, %s1844_s18   ;;  %s1461_s20 = sadd.s32 4294967294, %s1844_s18   ;;  %s1844_s18 = sphi %s1896_s18, %s2223_s18   ;;  %s1840_s17 = sphi %s1894_s17, %s2222_s17   ;;  %s1836_s16 = sphi %s1892_s16, %s2221_s16   ;;  %s1832_s15 = sphi %s1890_s15, %s2220_s15  }
   0x7   : > { %p41_p0 = scmp.ne.s32.totalorder %s1836_s16, %s1832_s15  ;;  %p2204_p1 = scmp.eq.s32.totalorder %s1911_s19, 0 }
   0x8   : > { %p134_p3 = scmp.eq.s32.totalorder %s1461_s20, 1  ;;  %p1462_p5 = scmp.ge.s32.totalorder %s1844_s18, 1 }
   0x9   : > { %p1920_p4 = por %p2204_p1, %p41_p0  ;;  %p141_p7 = scmp.lt.s32.totalorder %s1844_s18, 3 }
   0xa   : > { %p1925_p6 = por %p134_p3, %p41_p0  ;;  %s1846_s24 = smov [#allocation5]  }
   0xb   : > { %s2207_s21 = scalar_select %p1920_p4, 1, 0 }
   0xc   : > { %s2208_s22 = scalar_select %p1925_p6, 1, 0 }
   0xd   : > { %p1930_p8 = pnand %p1462_p5, %p141_p7  ;;  %s153_s25 = sshll.u32 %s1846_s24, 4  ;;  %s1934_s25 = int_to_ptr.vmem [resolvable:$true] %s153_s25 }
   0xe   : > { %s1847_s27 = smov [#allocation7]   ;;  %s1688_s5 = scalar_lea.hbm %s2200_s1, 512 }
   0xf   : > { %p1602_p9 = pneg %p1930_p8  ;;  %s166_s28 = sshll.u32 %s1847_s27, 4  ;;  %s1945_s28 = int_to_ptr.vmem [resolvable:$true] %s166_s28 }
  0x10   : > { %p1689_p12 = scmp.ne.s32.totalorder %s2200_s1, %s1688_s5  ;;  %p1695_p5 = scmp.lt.u32.totalorder %s1688_s5, %s2200_s1 }
  0x11   : > { %p1941_p11 = pnand %p1602_p9, %p2204_p1 }
  0x13   : > { %p1690_p13 = pneg %p1941_p11 }
  0x15   : > { %p1691_p0 = pnand %p1690_p13, %p1689_p12 }
  0x17   : > { %p1692_p3 = pneg %p1691_p0 }
  0x19   : > { %p1697_p7 = pnand %p1695_p5, %p1692_p3 }
  0x1b   : > { %1700 = shalt.err (!%p1697_p7)
}
  0x1c   : > { %s1701_s10 = scalar_lea.vmem %s1934_s25, 512  ;;  %p1709_p2 = scmp.lt.s32.totalorder %s1934_s25, %s1934_s25 }
  0x1d   : > { %p1702_p9 = scmp.ne.s32.totalorder %s1934_s25, %s1701_s10  ;;  %p1710_p12 = scmp.lt.s32.totalorder %s1701_s10, %s1701_s10 }
  0x1f   : > { %p1704_p10 = pnand %p1702_p9, %p1690_p13  ;;  %p1711_p0 = por %p1710_p12, %p1709_p2 }
  0x21   : > { %p1705_p1 = pneg %p1704_p10 }
  0x23   : > { %p1712_p6 = pnand %p1711_p0, %p1705_p1 }
  0x25   : > { %1715 = shalt.err (!%p1712_p6)
}
  0x26   : > { %s1848_s11 = smov 128   ;;  %s1849_s12 = smov 8  }
  0x27   : > { %1605 = dma.hbm_to_vmem [thread:$0]  (!%p1941_p11), %s2200_s1, 512, %s1934_s25, [#allocation6], %s1848_s11, %s1848_s11, %s1849_s12  }
  0x28   : > { %s1716_s27 = scalar_lea.hbm %s2201_s2, 512 }
  0x29   : > { %p1717_p2 = scmp.ne.s32.totalorder %s2201_s2, %s1716_s27  ;;  %p1723_p10 = scmp.lt.u32.totalorder %s1716_s27, %s2201_s2 }
  0x2b   : > { %p1719_p1 = pnand %p1717_p2, %p1690_p13 }
  0x2d   : > { %p1720_p6 = pneg %p1719_p1 }
  0x2f   : > { %p1725_p3 = pnand %p1723_p10, %p1720_p6 }
  0x31   : > { %1728 = shalt.err (!%p1725_p3)
}
  0x32   : > { %s1729_s25 = scalar_lea.vmem %s1945_s28, 512  ;;  %p1737_p12 = scmp.lt.s32.totalorder %s1945_s28, %s1945_s28 }
  0x33   : > { %p1730_p5 = scmp.ne.s32.totalorder %s1945_s28, %s1729_s25  ;;  %p1738_p0 = scmp.lt.s32.totalorder %s1729_s25, %s1729_s25 }
  0x35   : > { %p1732_p7 = pnand %p1730_p5, %p1690_p13  ;;  %p1739_p2 = por %p1738_p0, %p1737_p12 }
  0x37   : > { %p1733_p9 = pneg %p1732_p7 }
  0x39   : > { %p1740_p1 = pnand %p1739_p2, %p1733_p9 }
  0x3b   : > { %1743 = shalt.err (!%p1740_p1)
}
  0x3c   : > { %1608 = dma.hbm_to_vmem [thread:$0]  (!%p1941_p11), %s2201_s2, 512, %s1945_s28, [#allocation6], %s1848_s11, %s1848_s11, %s1849_s12  }
  0x3d   : > { %s2000_s9 = sadd.s32 1, %s1844_s18   ;;  %s28_s26 = sadd.s32 1, %s1840_s17 }
  0x3e   : > { %s25_s10 = ssub.s32 %s1844_s18, %s2000_s9  ;;  %p35_p13 = scmp.ne.s32.totalorder %s1840_s17, %s1836_s16 }
  0x3f   : > { %p26_p6 = scmp.eq.s32.totalorder %s25_s10, 0  ;;  %p36_p10 = scmp.eq.s32.totalorder %s1844_s18, 0 }
  0x40   : > { %p2211_p3 = scmp.eq.s32.totalorder %s1911_s19, 1  ;;  %p1619_p7 = scmp.lt.s32.totalorder %s1844_s18, 2 }
  0x41   : > { %s2016_s14 = scalar_select %p26_p6, %s1840_s17, %s28_s26  }
  0x42   : > { %p2010_p5 = por %p2211_p3, %p35_p13  ;;  %p37_p9 = por %p36_p10, %p35_p13 }
  0x43   : > { %s183_s20 = sand.u32 1, %s1840_s17   ;;  %s1467_s28 = sshll.u32 %s1844_s18, 7 }
  0x44   : > { %s2212_s13 = scalar_select %p2010_p5, 1, 0 }
  0x45   : > { %s1466_s24 = sshll.u32 %s183_s20, 3  ;;  %s2023_s27 = scalar_lea.hbm %s2199_s0, %s1467_s28 }
  0x46   : > { %s187_s29 = scalar_lea.vmem [#allocation2], %s1466_s24  ;;  %p2027_p11 = pnand %p1619_p7, %p37_p9 }
  0x47   : > { %s194_s30 = sshll.u32 %s187_s29, 4  ;;  %s184_s6 = scalar_lea.sflag [#allocation3], %s183_s20  ;;  %s2025_s30 = int_to_ptr.vmem [resolvable:$true] %s194_s30 }
  0x48   : > { %s1744_s25 = scalar_lea.hbm %s2023_s27, 128  ;;  %p1746_p0 = pneg %p2027_p11 }
  0x49   : > { %p1745_p12 = scmp.ne.s32.totalorder %s2023_s27, %s1744_s25  ;;  %s1749_s26 = scalar_lea.hbm %s2199_s0, 256 }
  0x4a   : > { %p1750_p13 = scmp.lt.u32.totalorder %s2023_s27, %s2199_s0  ;;  %p1751_p6 = scmp.lt.u32.totalorder %s1749_s26, %s1744_s25 }
  0x4b   : > { %p1747_p2 = pnand %p1746_p0, %p1745_p12  ;;  %p1753_p3 = scmp.lt.u32.totalorder %s1744_s25, %s2023_s27 }
  0x4c   : > { %p1752_p10 = por %p1751_p6, %p1750_p13 }
  0x4d   : > { %p1748_p1 = pneg %p1747_p2 }
  0x4e   : > { %p1754_p7 = por %p1753_p3, %p1752_p10 }
  0x50   : > { %p1755_p9 = pnand %p1754_p7, %p1748_p1 }
  0x52   : > { %1758 = shalt.err (!%p1755_p9)
}
  0x53   : > { %s1759_s20 = scalar_lea.vmem %s2025_s30, 128  ;;  %s1850_s28 = smov [#allocation2]  }
  0x54   : > { %p1760_p12 = scmp.ne.s32.totalorder %s2025_s30, %s1759_s20  ;;  %s1764_s11 = sshll.u32 %s1850_s28, 4  ;;  %s1765_s11 = int_to_ptr.vmem [resolvable:$false] %s1764_s11 }
  0x55   : > { %s1766_s12 = scalar_lea.vmem %s1765_s11, 256  ;;  %p1767_p4 = scmp.lt.s32.totalorder %s2025_s30, %s1765_s11 }
  0x56   : > { %p1762_p2 = pnand %p1760_p12, %p1746_p0  ;;  %p1768_p13 = scmp.lt.s32.totalorder %s1766_s12, %s1759_s20 }
  0x58   : > { %p1763_p5 = pneg %p1762_p2  ;;  %p1769_p6 = por %p1768_p13, %p1767_p4 }
  0x5a   : > { %p1770_p10 = pnand %p1769_p6, %p1763_p5 }
  0x5c   : > { %1773 = shalt.err (!%p1770_p10)
}
  0x5d   : > { %1612 = dma.hbm_to_vmem [thread:$0]  (!%p2027_p11), %s2023_s27, 128, %s2025_s30, %s184_s6  }
  0x5e   : > { %203 = sbr.rel (%p1930_p8) target bundleno = 1650 (0x672), region = 36  ;;  %s2059_s29 = sand.u32 (!%p1930_p8), 1, %s1836_s16  }
  0x5f   : > { %s1469_s25 = sshll.u32 (!%p1930_p8), %s2059_s29, 3  ;;  %s206_s7 = scalar_lea.sflag (!%p1930_p8), [#allocation3], %s2059_s29 }
  0x60   : > { %s209_s8 = scalar_lea.vmem (!%p1930_p8), [#allocation2], %s1469_s25  ;;  %p2214_p4 = scmp.ne.s32.totalorder (!%p1930_p8), %s2207_s21, 0 }
  0x65   : > { %1819 = dma.done.wait (%p2214_p4), %s206_s7, 128  }
  0x66   : > { %1821 = vsyncadd (%p2214_p4), %s206_s7, 4294967168  ;;  %p2215_p5 = scmp.eq.s32.totalorder %s1911_s19, 0 }
  0x68   : > { %1823 = dma.done.wait (%p2215_p5), [#allocation6], 1024   ;;  %p2216_p8 = pmov %p2215_p5 }
  0x69   : > { %v1851_v0 = vmov 0.0|0.0   ;;  %vm1852_vm0 = vmmov 0   ;;  %v1853_v1 = vmov 0.0   ;;  %v243_v2 = vld [vmem:[#allocation5] sm:$0xff]  ;;  %v244_v3 = vld [vmem:[#allocation5 + $0x8] sm:$0xff]  ;;  %v245_v4 = vld [vmem:[#allocation5 + $0x10] sm:$0xff]  ;;  %v762_v22 = vlaneseq }
  0x6a   : > { %1825 = vsyncadd (%p2216_p8), [#allocation6], 4294966272  ;;  %1578 = vmatprep.subr.bf16.mxu0 %v1851_v0  ;;  %1524 = vmatprep.mubr.msk.f32.mxu0 %vm1852_vm0, %v1853_v1  ;;  %v1579_v5 = vpack.c.bf16 %v244_v3, %v243_v2  ;;  %v246_v6 = vld [vmem:[#allocation5 + $0x18] sm:$0xff]  ;;  %vm252_vm1 = vcmask 261120   ;;  %s1854_s21 = smov 104   ;;  %s1855_s23 = smov 120  }
  0x6b   : > { %1532 = vmatprep.subr.mxu1 %v1853_v1  ;;  %1534 = vmatprep.mubr.msk.f32.mxu1 %vm1852_vm0, %v1853_v1  ;;  %v1582_v7 = vpack.c.bf16 %v246_v6, %v245_v4  ;;  %v242_v8 = vld [vmem:[%s209_s8] sm:$0xff]  ;;  %s1856_s27 = smov 96   ;;  %s1857_s30 = smov 112   ;;  %vm473_vm2 = vcmask 64512   ;;  %v2107_v23 = vshrl.u32 %v762_v22, 7  ;;  %v765_v24 = vand.u32 127, %v762_v22 }
  0x6c   : > { %1580 = vmatpush3.bf16.msra.mxu0 %v1579_v5  ;;  %s1858_s5 = smov 64   ;;  %v247_v3 = vld [vmem:[#allocation7] sm:$0xff]  ;;  %v248_v4 = vld [vmem:[#allocation7 + $0x8] sm:$0xff]  ;;  %s1861_s6 = smov 16   ;;  %vm1274_vm4 = vcmask 130048   ;;  %vm1276_vm5 = vcmask 195584  }
  0x6d   : > { %1581 = vmatprep.subr.bf16.mxu0 %v1851_v0  ;;  %vm766_vm3 = vcmp.le.s32.totalorder %v765_v24, %v2107_v23  ;;  %v1585_v5 = vpack.c.bf16 %v248_v4, %v247_v3  ;;  %s1862_s26 = smov 8   ;;  %s1863_s10 = smov 24  }
  0x6e   : > { %s1487_s28 = sshll.u32 %s1911_s19, 7  ;;  %s241_s11 = scalar_lea.vmem [#allocation8], %s1469_s25 }
  0x6f   : > { %s1372_s12 = sshll.u32 %s241_s11, 4  ;;  %p2217_p0 = scmp.ne.s32.totalorder %s2212_s13, 0  ;;  %s2156_s12 = int_to_ptr.vmem [resolvable:$true] %s1372_s12 }
  0x70   : > { %1583 = vmatpush3.bf16.msra.mxu0 %v1582_v7  ;;  %s1774_s19 = scalar_lea.vmem %s2156_s12, 128  ;;  %s1864_s25 = smov [#allocation8]  }
  0x71   : > { %1527 = vmatprep.subr.mxu0 %v1853_v1  ;;  %p1775_p11 = scmp.ne.s32.totalorder %s2156_s12, %s1774_s19 }
  0x73   : > { %1525 = vmatmul.mubr.msk.f32.vlgmr.msra.gmra.mrb[0].mxu0 %vm252_vm1, %v242_v8  ;;  %p1776_p1 = pnand %p1775_p11, %p2217_p0 }
  0x74   : > { %1529 = vmatprep.mubr.msk.f32.mxu0 %vm1852_vm0, %v1853_v1 }
  0x75   : > { %p1777_p3 = pneg %p1776_p1 }
 0x146   : > { %v2084_v9 = vpop.f32.mrb[0].mxu0 }
 0x147   : > { %331 = vrot.lane.b32.xlu1 %v2084_v9, %s1854_s21  ;;  %327 = vrot.lane.b32.xlu0 %v2084_v9, %s1855_s23  ;;  %v1526_v10 = vpop.f32.mrb[1].mxu0  ;;  %s2154_s21 = scalar_lea.hbm %s2203_s4, %s1487_s28  ;;  %s1359_s23 = scalar_lea.sflag [#allocation4], %s2059_s29 }
 0x14b   : > { %333 = vrot.lane.b32.xlu1 %v2084_v9, %s1856_s27  ;;  %329 = vrot.lane.b32.xlu0 %v2084_v9, %s1857_s30 }
 0x1b9   : > { %v328_v11 = vpop.permute.xlu0 %327  ;;  %v332_v12 = vpop.permute.xlu1 %331 }
 0x1ba   : > { %335 = vrot.lane.b32.xlu0 %v328_v11, %s1856_s27 }
 0x1bd   : > { %v330_v13 = vpop.permute.xlu0 %329  ;;  %v334_v14 = vpop.permute.xlu1 %333 }
 0x1be   : > { %339 = vrot.lane.b32.xlu0 %v332_v12, %s1856_s27  ;;  %337 = vrot.lane.b32.xlu1 %v330_v13, %s1856_s27  ;;  %s1778_s27 = sshll.u32 %s1864_s25, 4  ;;  %s1779_s27 = int_to_ptr.vmem [resolvable:$false] %s1778_s27 }
 0x1bf   : > { %s1780_s30 = scalar_lea.vmem %s1779_s27, 256  ;;  %p1781_p7 = scmp.lt.s32.totalorder %s2156_s12, %s1779_s27 }
 0x1c0   : > { %p1782_p9 = scmp.lt.s32.totalorder %s1780_s30, %s1774_s19 }
 0x1c2   : > { %p1783_p12 = por %p1782_p9, %p1781_p7 }
 0x1c4   : > { %p1784_p2 = pnand %p1783_p12, %p1777_p3 }
 0x1e7   : > { %345 = vxpose.xlu1.b32.start.end [1/1] (short) (narrow) %v334_v14, 8 }
 0x22c   : > { %v336_v15 = vpop.permute.xlu0 %335 }
 0x22d   : > { %377 = vxpose.xlu0.b32.start.end [1/1] (short) (narrow) %v336_v15, 8 }
 0x230   : > { %v338_v16 = vpop.permute.xlu1 %337  ;;  %v340_v17 = vpop.permute.xlu0 %339 }
 0x231   : > { %409 = vxpose.xlu0.b32.start.end [1/1] (short) (narrow) %v338_v16, 8 }
 0x235   : > { %441 = vxpose.xlu0.b32.start.end [1/1] (short) (narrow) %v340_v17, 8 }
 0x267   : > { %v361_v18 = vpop.trf.xlu1 }
 0x268   : > { %1528 = vmatpush3.msra.mxu0 %v361_v18  ;;  %v1860_v18 = vmov 1934713408  }
 0x269   : > { %1530 = vmatmul.mubr.msk.f32.vlgmr.msra.gmra.mrb[2].mxu0 %vm473_vm2, %v2084_v9  ;;  %1542 = vmatprep.subr.mxu0 %v1853_v1 }
 0x26a   : > { %1544 = vmatprep.mubr.msk.f32.mxu0 %vm1852_vm0, %v1853_v1 }
 0x2ad   : > { %v393_v19 = vpop.trf.xlu0 }
 0x2ae   : > { %1533 = vmatpush3.msra.mxu1 %v393_v19  ;;  %v1160_v19 = vunpack.c.l.s4 %v1860_v18 }
 0x2af   : > { %1535 = vmatmul.mubr.msk.f32.vlgmr.msra.gmra.mrb[0].mxu1 %vm473_vm2, %v328_v11  ;;  %1537 = vmatprep.subr.mxu1 %v1853_v1 }
 0x2b0   : > { %1539 = vmatprep.mubr.msk.f32.mxu1 %vm1852_vm0, %v1853_v1 }
 0x2b1   : > { %v425_v20 = vpop.trf.xlu0 }
 0x2b2   : > { %1538 = vmatpush3.msra.mxu1 %v425_v20 }
 0x2b3   : > { %1540 = vmatmul.mubr.msk.f32.vlgmr.msra.gmra.mrb[2].mxu1 %vm473_vm2, %v330_v13  ;;  %1547 = vmatprep.subr.mxu1 %v1853_v1 }
 0x2b4   : > { %1549 = vmatprep.mubr.msk.f32.mxu1 %vm1852_vm0, %v1853_v1 }
 0x2b5   : > { %v457_v21 = vpop.trf.xlu0 }
 0x2b6   : > { %1543 = vmatpush3.msra.mxu0 %v457_v21 }
 0x2b7   : > { %1545 = vmatmul.mubr.msk.f32.vlgmr.msra.gmra.mrb[4].mxu0 %vm473_vm2, %v332_v12  ;;  %1552 = vmatprep.subr.mxu0 %v1853_v1 }
 0x2b8   : > { %1554 = vmatprep.mubr.msk.f32.mxu0 %vm1852_vm0, %v1853_v1 }
 0x33c   : > { %v542_v25 = vpop.f32.mrb[2].mxu0 }
 0x33d   : > { %v769_v26 = vsel %vm766_vm3, %v542_v25, -1e+30  ;;  %v1531_v27 = vpop.f32.mrb[3].mxu0 }
 0x33e   : > { %v773_v28 = vsel %vm473_vm2, %v769_v26, -inf }
 0x33f   : > { %774 = vmax.xlane.f32.xlu1 %v773_v28 }
 0x350   : > { %885 = vrot.lane.b32.xlu1 %v328_v11, %s1858_s5 }
 0x382   : > { %v614_v29 = vpop.f32.mrb[0].mxu1 }
 0x383   : > { %v770_v30 = vsel %vm766_vm3, %v614_v29, -1e+30  ;;  %v1536_v31 = vpop.f32.mrb[1].mxu1  ;;  %v1161_v29 = vunpack.c.0.s8 %v1160_v19 }
 0x384   : > { %v776_v32 = vsel %vm473_vm2, %v770_v30, -inf }
 0x385   : > { %777 = vmax.xlane.f32.xlu0 %v776_v32 }
 0x386   : > { %v686_v33 = vpop.f32.mrb[2].mxu1 }
 0x387   : > { %v1541_v34 = vpop.f32.mrb[3].mxu1  ;;  %v771_v39 = vsel %vm766_vm3, %v686_v33, -1e+30 }
 0x388   : > { %v779_v40 = vsel %vm473_vm2, %v771_v39, -inf }
 0x38a   : > { %v758_v35 = vpop.f32.mrb[4].mxu0 }
 0x38b   : > { %v772_v36 = vsel %vm766_vm3, %v758_v35, -1e+30  ;;  %v1546_v37 = vpop.f32.mrb[5].mxu0 }
 0x38c   : > { %v782_v38 = vsel %vm473_vm2, %v772_v36, -inf }
 0x38d   : > { %783 = vmax.xlane.f32.xlu1 %v782_v38  ;;  %v1164_v38 = vsub.s32 %v1161_v29, %v2107_v23 }
 0x391   : > { %780 = vmax.xlane.f32.xlu1 %v779_v40 }
 0x39b   : > { %809 = vrot.lane.b32.xlu0 %v2084_v9, %s1858_s5 }
 0x39f   : > { %1037 = vrot.lane.b32.xlu0 %v332_v12, %s1858_s5 }
 0x3a2   : > { %961 = vrot.lane.b32.xlu1 %v330_v13, %s1858_s5  ;;  %v1859_v13 = vmov 1983009808  }
 0x3a3   : > { %v1128_v14 = vunpack.c.l.s4 %v1859_v13 }
 0x3cc   : > { %v775_v41 = vpop.xlane.xlu1 %774 }
 0x3cd   : > { %v785_v42 = vsub.f32 %v769_v26, %v775_v41 }
 0x3cf   : > { %v789_v43 = vmul.f32 1.442695, %v785_v42 }
 0x3d0   : > { %v886_v44 = vpop.permute.xlu1 %885 }
 0x3d1   : > { %1672 = vpow2.f32 %v789_v43  ;;  %1553 = vmatpush3.msra.mxu0 %v886_v44 }
 0x3d2   : > { %1562 = vmatprep.subr.mxu0 %v1853_v1 }
 0x3db   : > { %v1673_v45 = vpop.eup %1672 }
 0x3dc   : > { %v797_v46 = vsel %vm473_vm2, %v1673_v45, 0.0 }
 0x3dd   : > { %798 = vadd.xlane.f32.xlu1 %v797_v46  ;;  %v250_v46 = vld [vmem:[#allocation7 + $0x18] sm:$0xff] }
 0x412   : > { %v778_v47 = vpop.xlane.xlu0 %777 }
 0x413   : > { %v786_v48 = vsub.f32 %v770_v30, %v778_v47 }
 0x415   : > { %v791_v49 = vmul.f32 1.442695, %v786_v48 }
 0x416   : > { %v810_v50 = vpop.permute.xlu0 %809 }
 0x417   : > { %1674 = vpow2.f32 %v791_v49  ;;  %1548 = vmatpush3.msra.mxu1 %v810_v50 }
 0x418   : > { %1550 = vmatmul.mubr.msk.f32.vlgmr.msra.gmra.mrb[4].mxu1 %vm473_vm2, %v1673_v45  ;;  %1557 = vmatprep.subr.mxu1 %v1853_v1  ;;  %v249_v45 = vld [vmem:[#allocation7 + $0x10] sm:$0xff] }
 0x419   : > { %1559 = vmatprep.mubr.msk.f32.mxu1 %vm1852_vm0, %v1853_v1 }
 0x41a   : > { %v784_v51 = vpop.xlane.xlu1 %783  ;;  %v1038_v58 = vpop.permute.xlu0 %1037 }
 0x41b   : > { %v788_v52 = vsub.f32 %v772_v36, %v784_v51  ;;  %v1588_v51 = vpack.c.bf16 %v250_v46, %v249_v45 }
 0x41d   : > { %v795_v53 = vmul.f32 1.442695, %v788_v52 }
 0x41e   : > { %v781_v54 = vpop.xlane.xlu1 %780 }
 0x41f   : > { %1676 = vpow2.f32 %v795_v53  ;;  %v787_v55 = vsub.f32 %v771_v39, %v781_v54 }
 0x421   : > { %v1675_v56 = vpop.eup %1674  ;;  %v793_v57 = vmul.f32 1.442695, %v787_v55 }
 0x422   : > { %1555 = vmatmul.mubr.msk.f32.vlgmr.msra.gmra.mrb[6].mxu0 %vm473_vm2, %v1675_v56  ;;  %v962_v59 = vpop.permute.xlu1 %961  ;;  %v800_v60 = vsel %vm473_vm2, %v1675_v56, 0.0 }
 0x423   : > { %1678 = vpow2.f32 %v793_v57  ;;  %1563 = vmatpush3.msra.mxu0 %v1038_v58  ;;  %801 = vadd.xlane.f32.xlu0 %v800_v60 }
 0x424   : > { %1558 = vmatpush3.msra.mxu1 %v962_v59  ;;  %1564 = vmatprep.mubr.msk.f32.mxu0 %vm1852_vm0, %v1853_v1 }
 0x425   : > { %1584 = vmatprep.subr.bf16.mxu1 %v1851_v0 }
 0x429   : > { %v1677_v61 = vpop.eup %1676 }
 0x42a   : > { %1565 = vmatmul.mubr.msk.f32.vlgmr.msra.gmra.mrb[8].mxu0 %vm473_vm2, %v1677_v61  ;;  %v806_v62 = vsel %vm473_vm2, %v1677_v61, 0.0 }
 0x42b   : > { %807 = vadd.xlane.f32.xlu1 %v806_v62 }
 0x42d   : > { %v1679_v63 = vpop.eup %1678 }
 0x42e   : > { %1560 = vmatmul.mubr.msk.f32.vlgmr.msra.gmra.mrb[6].mxu1 %vm473_vm2, %v1679_v63  ;;  %v803_v2 = vsel %vm473_vm2, %v1679_v63, 0.0 }
 0x42f   : > { %804 = vadd.xlane.f32.xlu0 %v803_v2  ;;  %1575 = vmatprep.mubr.msk.f32.mxu1 %vm1852_vm0, %v1853_v1  ;;  %v1129_v1 = vunpack.c.0.s8 %v1128_v14 }
 0x430   : > { %1586 = vmatpush3.bf16.msra.mxu1 %v1585_v5 }
 0x431   : > { %1587 = vmatprep.subr.bf16.mxu1 %v1851_v0  ;;  %v1132_v20 = vsub.s32 %v1129_v1, %v2107_v23 }
 0x434   : > { %1589 = vmatpush3.bf16.msra.mxu1 %v1588_v51 }
 0x46a   : > { %v799_v7 = vpop.xlane.xlu1 %798 }
 0x4b0   : > { %v802_v9 = vpop.xlane.xlu0 %801 }
 0x4b1   : > { %1680 = vrcp.f32 %v802_v9 }
 0x4b8   : > { %v808_v10 = vpop.xlane.xlu1 %807 }
 0x4b9   : > { %1682 = vrcp.f32 %v808_v10 }
 0x4ba   : > { %1684 = vrcp.f32 %v799_v7 }
 0x4bb   : > { %v1681_v16 = vpop.eup %1680 }
 0x4bc   : > { %v805_v11 = vpop.xlane.xlu0 %804 }
 0x4bd   : > { %1686 = vrcp.f32 %v805_v11 }
 0x4c3   : > { %v1683_v17 = vpop.eup %1682 }
 0x4c4   : > { %v1685_v25 = vpop.eup %1684 }
 0x4c7   : > { %v1687_v28 = vpop.eup %1686 }
 0x4eb   : > { %v881_v6 = vpop.f32.mrb[4].mxu1 }
 0x4ec   : > { %v1551_v8 = vpop.f32.mrb[5].mxu1  ;;  %v1121_v31 = vmul.f32 %v1685_v25, %v881_v6 }
 0x4f5   : > { %v957_v12 = vpop.f32.mrb[6].mxu0 }
 0x4f6   : > { %v1556_v15 = vpop.f32.mrb[7].mxu0  ;;  %v1122_v21 = vmul.f32 %v1681_v16, %v957_v12 }
 0x4f7   : > { %v1484_v15 = vld [vmem:[%s2202_s3] ss:$0 sm:$0xff] }
 0x4fd   : > { %v1109_v0 = vpop.f32.mrb[8].mxu0 }
 0x4fe   : > { %v1124_v22 = vmul.f32 %v1683_v17, %v1109_v0  ;;  %v1566_v24 = vpop.f32.mrb[9].mxu0 }
 0x500   : > { %v1141_v26 = vcombine.low %v1122_v21, %v1124_v22  ;;  %v1142_v27 = vcombine.high %v1122_v21, %v1124_v22 }
 0x501   : > { %v1033_v30 = vpop.f32.mrb[6].mxu1 }
 0x502   : > { %v1149_v32 = vrot.slane %v1141_v26, %v1132_v20  ;;  %v1156_v33 = vrot.slane %v1142_v27, %v1132_v20  ;;  %v1123_v34 = vmul.f32 %v1687_v28, %v1033_v30  ;;  %v1561_v35 = vpop.f32.mrb[7].mxu1 }
 0x504   : > { %v1125_v36 = vcombine.low %v1121_v31, %v1123_v34  ;;  %v1126_v37 = vcombine.high %v1121_v31, %v1123_v34 }
 0x506   : > { %v1133_v39 = vrot.slane %v1125_v36, %v1132_v20  ;;  %v1140_v40 = vrot.slane %v1126_v37, %v1132_v20 }
 0x508   : > { %v1157_v41 = vcombine.low %v1133_v39, %v1149_v32  ;;  %v1158_v42 = vcombine.high %v1133_v39, %v1149_v32  ;;  %v1173_v43 = vcombine.low %v1140_v40, %v1156_v33  ;;  %v1174_v44 = vcombine.high %v1140_v40, %v1156_v33 }
 0x50a   : > { %v1165_v47 = vrot.slane %v1157_v41, %v1164_v38  ;;  %v1172_v48 = vrot.slane %v1158_v42, %v1164_v38  ;;  %v1181_v49 = vrot.slane %v1173_v43, %v1164_v38  ;;  %v1188_v50 = vrot.slane %v1174_v44, %v1164_v38 }
 0x50c   : > { %v1193_v52 = vcombine.low %v1165_v47, %v1172_v48  ;;  %v1482_v53 = vcombine.high %v1165_v47, %v1172_v48  ;;  %v1209_v54 = vcombine.low %v1181_v49, %v1188_v50  ;;  %v1483_v55 = vcombine.high %v1181_v49, %v1188_v50 }
 0x50e   : > { %v1200_v56 = vrot.slane %v1193_v52, %v1132_v20  ;;  %v1208_v23 = vrot.slane %v1482_v53, %v1132_v20  ;;  %v1216_v57 = vrot.slane %v1209_v54, %v1132_v20  ;;  %v1224_v58 = vrot.slane %v1483_v55, %v1132_v20 }
 0x510   : > { %v1226_v59 = vcombine.high %v1200_v56, %v1208_v23  ;;  %v1242_v60 = vcombine.high %v1216_v57, %v1224_v58  ;;  %v1225_v61 = vcombine.low %v1200_v56, %v1208_v23  ;;  %v1241_v62 = vcombine.low %v1216_v57, %v1224_v58 }
 0x512   : > { %v1240_v63 = vrot.slane %v1226_v59, %v1164_v38  ;;  %v1256_v2 = vrot.slane %v1242_v60, %v1164_v38  ;;  %v1233_v3 = vrot.slane %v1225_v61, %v1164_v38  ;;  %v1249_v4 = vrot.slane %v1241_v62, %v1164_v38 }
 0x514   : > { %v1259_v5 = vcombine.low %v1240_v63, %v1256_v2  ;;  %v1258_v6 = vcombine.high %v1233_v3, %v1249_v4  ;;  %v1260_v7 = vcombine.high %v1240_v63, %v1256_v2  ;;  %v1257_v8 = vcombine.low %v1233_v3, %v1249_v4 }
 0x516   : > { %1266 = vrot.lane.b32.xlu1 %v1259_v5, %s1861_s6  ;;  %1262 = vrot.lane.b32.xlu0 %v1258_v6, %s1862_s26 }
 0x51a   : > { %1270 = vrot.lane.b32.xlu1 %v1260_v7, %s1863_s10 }
 0x588   : > { %v1267_v9 = vpop.permute.xlu1 %1266  ;;  %v1263_v10 = vpop.permute.xlu0 %1262 }
 0x589   : > { %v1273_v11 = vsel %vm473_vm2, %v1257_v8, %v1263_v10 }
 0x58a   : > { %v1275_v13 = vsel %vm1274_vm4, %v1273_v11, %v1267_v9 }
 0x58c   : > { %v1271_v12 = vpop.permute.xlu1 %1270 }
 0x58d   : > { %v1277_v14 = vsel %vm1276_vm5, %v1275_v13, %v1271_v12 }
 0x58e   : > { %1576 = vmatmul.mubr.msk.f32.vlgmr.msra.gmra.mrb[8].mxu1 %vm252_vm1, %v1277_v14 }
 0x661   : > { %v1353_v1 = vpop.f32.mrb[8].mxu1 }
 0x662   : > { %v1354_v16 = vadd.f32 %v1484_v15, %v1353_v1  ;;  %v1577_v17 = vpop.f32.mrb[9].mxu1 }
 0x664   : > { %1357 = vst.msk [vmem:[%s241_s11] sm:$0xff] %vm252_vm1, %v1354_v16 }
 0x665   : > { %1787 = shalt.err (!%p1784_p2)
}
 0x666   : > { %s1788_s29 = scalar_lea.hbm %s2154_s21, 128  ;;  %s1792_s26 = scalar_lea.hbm %s2203_s4, 256 }
 0x667   : > { %p1789_p13 = scmp.ne.s32.totalorder %s2154_s21, %s1788_s29  ;;  %p1793_p4 = scmp.lt.u32.totalorder %s2154_s21, %s2203_s4 }
 0x668   : > { %p1794_p5 = scmp.lt.u32.totalorder %s1792_s26, %s1788_s29  ;;  %p1796_p11 = scmp.lt.u32.totalorder %s1788_s29, %s2154_s21 }
 0x669   : > { %p1790_p6 = pnand %p1789_p13, %p2217_p0 }
 0x66a   : > { %p1795_p8 = por %p1794_p5, %p1793_p4 }
 0x66b   : > { %p1791_p10 = pneg %p1790_p6 }
 0x66c   : > { %p1797_p1 = por %p1796_p11, %p1795_p8 }
 0x66e   : > { %p1798_p3 = pnand %p1797_p1, %p1791_p10 }
 0x670   : > { %1801 = shalt.err (!%p1798_p3)
}
 0x671   : > { %1600 = dma.vmem_to_hbm [thread:$0]  (%p2217_p0), %s2156_s12, 128, %s2154_s21, %s1359_s23  }
 0x672 PF: > { %s1384_s20 = sand.u32 1, %s1832_s15   ;;  %p2218_p7 = scmp.ne.s32.totalorder %s2208_s22, 0 }
 0x673   : > { %p2219_p9 = scmp.ge.s32.totalorder %s1844_s18, 2  ;;  %s1385_s28 = scalar_lea.sflag [#allocation4], %s1384_s20 }
 0x675   : > { %p1614_p12 = pnand %p2219_p9, %p2218_p7 }
 0x677   : > { %1827 = dma.done.wait (!%p1614_p12), %s1385_s28, 128  }
 0x678   : > { %1829 = vsyncadd (!%p1614_p12), %s1385_s28, 4294967168  ;;  %p18_p2 = scmp.ge.s32.totalorder %s2000_s9, 4   ;;  %s2220_s15 = smov %s1836_s16 }
 0x679   : > { %s2221_s16 = smov %s1840_s17  ;;  %s2222_s17 = smov %s2016_s14 }
 0x67a   : > { %s2223_s18 = smov %s2000_s9  ;;  %20 = sbr.rel (!%p18_p2) target bundleno = 6 (0x6), region = 89 }
 0x681   :  { %1390 = vsyncpa [#allocation3], 1 }
 0x682   :  { %1392 = vsyncpa [#allocation3 + $0x1], 1 }
 0x683   :  { %1393 = vsyncpa [#allocation6], 1 }
 0x684   :  { %1394 = vsyncpa [#allocation4], 1 }
 0x685   :  { %1396 = vsyncpa [#allocation4 + $0x1], 1 }

</bundles_post_ra>
